<compile_context>
chip_gen: v7x
topology: tpu7x:2x2x1
jax: 0.10.0
libtpu: 0.0.40
codegen_flags: <defaults>
</compile_context>

<pallas_src>
import math
import functools

import jax
import jax.numpy as jnp
from jax import lax
from jax.experimental import pallas as pl
from jax.experimental.pallas import tpu as pltpu

# ---- small config (consistent with the module's forward signature) ----
B       = 2            # batch_size
L       = 8            # title_length
H       = 32           # hidden_size
NH      = 4            # num_heads
DH      = H // NH      # head dim
VOCAB   = 50
NTOPICS = 10
NEG_INF = -1e9

BT = B                 # batch tile per grid step (whole batch at this toy size)


def news_encoder_kernel(x_ref, kbias_ref, wbias_ref,
                        wqkv_ref, wo_ref, wa_ref, ba_ref, va_ref,
                        sa_ref, nv_ref, ww_ref):
    """One batch tile (BT titles) per grid step; everything stays in VMEM.

    x_ref    : [BT*L, H]    f32  embedded titles (word + topic), flattened over batch
    kbias_ref: [BT*L, L]    f32  key-side mask bias, pre-broadcast per query row
    wbias_ref: [BT*L, 1]    f32  word-attention mask bias (column layout)
    wqkv_ref : [H, 3H]      bf16 fused Q|K|V projection
    wo_ref   : [H, H]       bf16 attention output projection
    wa_ref   : [H, H] bf16, ba_ref: [1, H] f32, va_ref: [H, 1] f32  word attention
    sa_ref   : [BT*L, NH*L] f32  self-attention slab (row b*L+q, lane h*L+k)
    nv_ref   : [BT, H]      f32  pooled news vectors
    ww_ref   : [BT*L, 1]    f32  word-attention weights (column layout)
    """
    x2d       = x_ref[...]                   # [BT*L, H]  f32
    key_bias  = kbias_ref[...]               # [BT*L, L]  f32
    word_bias = wbias_ref[...]               # [BT*L, 1]  f32

    scale = 1.0 / math.sqrt(DH)

    # ---- fused QKV projection for the whole tile (bf16 MXU operands, f32 acc) ----
    qkv = jnp.dot(x2d.astype(jnp.bfloat16), wqkv_ref[...],
                  preferred_element_type=jnp.float32)                    # [BT*L, 3H]

    # ---- multi-head self-attention (static unroll over tiny BT and NH) ----
    sa_rows, ctx_rows = [], []
    for b in range(BT):
        rs = slice(b * L, (b + 1) * L)
        qb = qkv[rs, 0:H]                    # [L, H]  f32
        kb = qkv[rs, H:2 * H]                # [L, H]  f32
        vb = qkv[rs, 2 * H:3 * H].astype(jnp.bfloat16)                   # [L, H] bf16
        kbias_b = key_bias[rs, :]            # [L, L]  (same key bias for every query)

        head_p, head_ctx = [], []
        for h in range(NH):
            cs = slice(h * DH, (h + 1) * DH)
            # q @ k^T via NT-form dot_general: contraction on dim 1 of both operands,
            # no explicit transpose of k (removes BT*NH tiny XLU transposes).
            s = lax.dot_general(qb[:, cs], kb[:, cs],
                                dimension_numbers=(((1,), (1,)), ((), ())),
                                preferred_element_type=jnp.float32) * scale   # [L, L]
            s = s + kbias_b                  # mask padded keys (f32 VPU math)
            s = s - jnp.max(s, axis=-1, keepdims=True)
            e = jnp.exp(s)
            p = e * pl.reciprocal(jnp.sum(e, axis=-1, keepdims=True), approx=True)
            head_p.append(p)
            head_ctx.append(jnp.dot(p.astype(jnp.bfloat16), vb[:, cs],
                                    preferred_element_type=jnp.float32))      # [L, DH]
        sa_rows.append(jnp.concatenate(head_p, axis=-1))                      # [L, NH*L]
        ctx_rows.append(jnp.concatenate(head_ctx, axis=-1))                   # [L, H]

    # Attention-prob slab assembled in registers -> ONE store (was BT*NH stores).
    # TODO(synk): for production with small L, consider packing as [BT, NH*L*L] so the
    #             stored last dim is a multiple of 128 lanes (fully unmasked vst).
    sa_ref[...] = jnp.concatenate(sa_rows, axis=0)                            # [BT*L, NH*L]

    # ---- single fused output projection + residual (residual kept in f32) ----
    ctx2d = jnp.concatenate(ctx_rows, axis=0).astype(jnp.bfloat16)            # [BT*L, H]
    h2d = x2d + jnp.dot(ctx2d, wo_ref[...], preferred_element_type=jnp.float32)

    # ---- additive word-attention pooling (projections batched over the tile) ----
    proj = jnp.tanh(jnp.dot(h2d.astype(jnp.bfloat16), wa_ref[...],
                            preferred_element_type=jnp.float32) + ba_ref[...])  # [BT*L, H]
    score = jnp.dot(proj, va_ref[...],
                    preferred_element_type=jnp.float32) + word_bias             # [BT*L, 1]

    nv_rows, alphas = [], []
    for b in range(BT):
        rs = slice(b * L, (b + 1) * L)
        sc = score[rs, :]                                                     # [L, 1]
        sc = sc - jnp.max(sc, axis=0, keepdims=True)
        es = jnp.exp(sc)
        alpha = es * pl.reciprocal(jnp.sum(es, axis=0, keepdims=True), approx=True)
        alphas.append(alpha)
        # Pooled vector as a TN-form matmul (contract the word axis on the MXU):
        # produces a [1, H] row directly, no cross-sublane XLU reduce.
        nv_rows.append(lax.dot_general(alpha, h2d[rs, :],
                                       dimension_numbers=(((0,), (0,)), ((), ())),
                                       preferred_element_type=jnp.float32))   # [1, H]

    nv_ref[...] = jnp.concatenate(nv_rows, axis=0)     # ONE store   [BT, H]
    ww_ref[...] = jnp.concatenate(alphas, axis=0)      # ONE store   [BT*L, 1]


def candidate_news_semantic(params, news_word_ids, news_topic_ids, news_mask=None):
    """Forward pass. Returns (news_vector [B,H], word_weights [B,L],
    self_attention [B,NH,L,L]) — matching the PyTorch module's outputs."""
    Bsz, Lsz = news_word_ids.shape
    assert Bsz == B and Lsz == L

    # Glue: embedding gathers + layout prep in plain JAX (cheap XLA ops).
    word_e  = jnp.take(params["word_emb"], news_word_ids, axis=0)       # [B, L, H]
    topic_e = jnp.take(params["topic_emb"], news_topic_ids, axis=0)     # [B, H]
    x2d = (word_e + topic_e[:, None, :]).astype(jnp.float32).reshape(B * L, H)

    if news_mask is None:
        mask = jnp.ones((B, L), jnp.float32)
    else:
        mask = news_mask.astype(jnp.float32)
    neg = (1.0 - mask) * NEG_INF                                        # [B, L]
    key_bias  = jnp.repeat(neg, L, axis=0)                              # [B*L, L] per-query rows
    word_bias = neg.reshape(B * L, 1)                                   # [B*L, 1]

    # Fused Q|K|V weight; bf16 MXU operands (weights stay resident in VMEM).
    wqkv  = jnp.concatenate([params["wq"], params["wk"], params["wv"]],
                            axis=1).astype(jnp.bfloat16)                # [H, 3H]
    wo_bf = params["wo"].astype(jnp.bfloat16)
    wa_bf = params["wa"].astype(jnp.bfloat16)

    grid = (B // BT,)   # == (1,) at this toy size; batch-tiled structure generalizes

    in_specs = [
        pl.BlockSpec((BT * L, H), lambda i: (i, 0)),       # x2d        (batch-tiled)
        pl.BlockSpec((BT * L, L), lambda i: (i, 0)),       # key bias   (batch-tiled)
        pl.BlockSpec((BT * L, 1), lambda i: (i, 0)),       # word bias  (batch-tiled)
        pl.BlockSpec((H, 3 * H),  lambda i: (0, 0)),       # wqkv       (resident)
        pl.BlockSpec((H, H),      lambda i: (0, 0)),       # wo         (resident)
        pl.BlockSpec((H, H),      lambda i: (0, 0)),       # wa         (resident)
        pl.BlockSpec((1, H),      lambda i: (0, 0)),       # ba         (resident)
        pl.BlockSpec((H, 1),      lambda i: (0, 0)),       # va         (resident)
    ]
    out_specs = [
        pl.BlockSpec((BT * L, NH * L), lambda i: (i, 0)),  # self-attention slab
        pl.BlockSpec((BT, H),          lambda i: (i, 0)),  # news vectors
        pl.BlockSpec((BT * L, 1),      lambda i: (i, 0)),  # word weights (column)
    ]
    out_shape = (
        jax.ShapeDtypeStruct((B * L, NH * L), jnp.float32),
        jax.ShapeDtypeStruct((B, H), jnp.float32),
        jax.ShapeDtypeStruct((B * L, 1), jnp.float32),
    )

    sa2d, news_vector, ww_col = pl.pallas_call(
        news_encoder_kernel,
        out_shape=out_shape,
        grid=grid,
        in_specs=in_specs,
        out_specs=out_specs,
        compiler_params=pltpu.CompilerParams(
            # batch-tile axis is independent -> shards across TCs on v7x once grid > 1
            dimension_semantics=("parallel",)),
    )(x2d, key_bias, word_bias, wqkv, wo_bf, wa_bf, params["ba"], params["va"])

    # Unpack kernel layouts back into the PyTorch module's output layouts (free XLA ops).
    word_weights   = ww_col.reshape(B, L)                                # [B, L]
    self_attention = sa2d.reshape(B, L, NH, L).transpose(0, 2, 1, 3)     # [B, NH, L, L]
    return news_vector, word_weights, self_attention


def init_params(key):
    ks = jax.random.split(key, 8)
    s = 0.02
    return {
        "word_emb":  jax.random.normal(ks[0], (VOCAB, H),   jnp.float32) * s,
        "topic_emb": jax.random.normal(ks[1], (NTOPICS, H), jnp.float32) * s,
        "wq": jax.random.normal(ks[2], (H, H), jnp.float32) * s,
        "wk": jax.random.normal(ks[3], (H, H), jnp.float32) * s,
        "wv": jax.random.normal(ks[4], (H, H), jnp.float32) * s,
        "wo": jax.random.normal(ks[5], (H, H), jnp.float32) * s,
        "wa": jax.random.normal(ks[6], (H, H), jnp.float32) * s,
        "ba": jnp.zeros((1, H), jnp.float32),
        "va": jax.random.normal(ks[7], (H, 1), jnp.float32) * s,
    }


if __name__ == "__main__":
    root = jax.random.PRNGKey(0)
    k_params, k_ids, k_topic = jax.random.split(root, 3)
    params = init_params(k_params)

    news_word_ids  = jax.random.randint(k_ids,   (B, L), 0, VOCAB,   dtype=jnp.int32)
    news_topic_ids = jax.random.randint(k_topic, (B,),   0, NTOPICS, dtype=jnp.int32)
    # mask out the last two tokens of the second title
    news_mask = jnp.array([[1] * L,
                           [1] * (L - 2) + [0, 0]], dtype=jnp.float32)

    fwd = jax.jit(functools.partial(candidate_news_semantic, params))
    news_vector, word_weights, self_attention = fwd(news_word_ids,
                                                    news_topic_ids,
                                                    news_mask)
    jax.block_until_ready((news_vector, word_weights, self_attention))

    # shape + basic numerical sanity checks
    assert news_vector.shape    == (B, H)
    assert word_weights.shape   == (B, L)
    assert self_attention.shape == (B, NH, L, L)
    assert bool(jnp.all(jnp.isfinite(news_vector)))
    assert bool(jnp.all(jnp.isfinite(word_weights)))
    assert bool(jnp.all(jnp.isfinite(self_attention)))
    # softmax rows sum to ~1 (approx reciprocal + bf16 MXU operands -> loose tolerance)
    assert bool(jnp.all(jnp.abs(jnp.sum(word_weights, axis=-1) - 1.0) < 1e-2))
    assert bool(jnp.all(jnp.abs(jnp.sum(self_attention, axis=-1) - 1.0) < 1e-2))
    # padded words of the second title get ~zero pooling weight
    assert bool(jnp.all(word_weights[1, L - 2:] < 1e-5))

    print("KERNEL_OK")
</pallas_src>

<mosaic_0001>
module attributes {stable_mosaic.version = 11 : i64} {
  func.func @news_encoder_kernel(%arg0: i32, %arg1: memref<16x32xf32, #tpu.memory_space<vmem>>, %arg2: memref<16x8xf32, #tpu.memory_space<vmem>>, %arg3: memref<16x1xf32, #tpu.memory_space<vmem>>, %arg4: memref<32x96xbf16, #tpu.memory_space<vmem>>, %arg5: memref<32x32xbf16, #tpu.memory_space<vmem>>, %arg6: memref<32x32xbf16, #tpu.memory_space<vmem>>, %arg7: memref<1x32xf32, #tpu.memory_space<vmem>>, %arg8: memref<32x1xf32, #tpu.memory_space<vmem>>, %arg9: memref<16x32xf32, #tpu.memory_space<vmem>>, %arg10: memref<2x32xf32, #tpu.memory_space<vmem>>, %arg11: memref<16x1xf32, #tpu.memory_space<vmem>>) attributes {dimension_semantics = [#tpu.dimension_semantics<parallel>], iteration_bounds = array<i64: 1>, scalar_prefetch = 0 : i64, scratch_operands = 0 : i64, tpu.core_type = #tpu.core_type<tc>, window_params = [{transform_indices = @transform_0, window_bounds = array<i64: 16, 32>}, {transform_indices = @transform_1, window_bounds = array<i64: 16, 8>}, {transform_indices = @transform_2, window_bounds = array<i64: 16, 1>}, {pipeline_mode = #tpu.pipeline_mode<synchronous>, transform_indices = @transform_3, window_bounds = array<i64: 32, 96>}, {pipeline_mode = #tpu.pipeline_mode<synchronous>, transform_indices = @transform_4, window_bounds = array<i64: 32, 32>}, {pipeline_mode = #tpu.pipeline_mode<synchronous>, transform_indices = @transform_5, window_bounds = array<i64: 32, 32>}, {pipeline_mode = #tpu.pipeline_mode<synchronous>, transform_indices = @transform_6, window_bounds = array<i64: 1, 32>}, {pipeline_mode = #tpu.pipeline_mode<synchronous>, transform_indices = @transform_7, window_bounds = array<i64: 32, 1>}, {transform_indices = @transform_8, window_bounds = array<i64: 16, 32>}, {transform_indices = @transform_9, window_bounds = array<i64: 2, 32>}, {transform_indices = @transform_10, window_bounds = array<i64: 16, 1>}]} {
    %c0 = arith.constant 0 : index
    %c0_0 = arith.constant 0 : index
    %0 = vector.load %arg1[%c0, %c0_0] : memref<16x32xf32, #tpu.memory_space<vmem>>, vector<16x32xf32>
    %c0_1 = arith.constant 0 : index
    %c0_2 = arith.constant 0 : index
    %1 = vector.load %arg2[%c0_1, %c0_2] : memref<16x8xf32, #tpu.memory_space<vmem>>, vector<16x8xf32>
    %c0_3 = arith.constant 0 : index
    %c0_4 = arith.constant 0 : index
    %2 = vector.load %arg3[%c0_3, %c0_4] : memref<16x1xf32, #tpu.memory_space<vmem>>, vector<16x1xf32>
    %3 = arith.truncf %0 : vector<16x32xf32> to vector<16x32xbf16>
    %c0_5 = arith.constant 0 : index
    %c0_6 = arith.constant 0 : index
    %4 = vector.load %arg4[%c0_5, %c0_6] : memref<32x96xbf16, #tpu.memory_space<vmem>>, vector<32x96xbf16>
    %cst = arith.constant dense<0.000000e+00> : vector<16x96xf32>
    %5 = tpu.matmul %3, %4, %cst {dimension_numbers = #tpu.dot_dimension_numbers<[1], [0], [0], [1], [0, 0, 1, 1], [], []>} : vector<16x32xbf16>, vector<32x96xbf16>, vector<16x96xf32> -> vector<16x96xf32>
    %6 = vector.extract_strided_slice %5 {offsets = [0, 0], sizes = [8, 32], strides = [1, 1]} : vector<16x96xf32> to vector<8x32xf32>
    %7 = vector.extract_strided_slice %5 {offsets = [0, 32], sizes = [8, 32], strides = [1, 1]} : vector<16x96xf32> to vector<8x32xf32>
    %8 = vector.extract_strided_slice %5 {offsets = [0, 64], sizes = [8, 32], strides = [1, 1]} : vector<16x96xf32> to vector<8x32xf32>
    %9 = arith.truncf %8 : vector<8x32xf32> to vector<8x32xbf16>
    %10 = vector.extract_strided_slice %1 {offsets = [0, 0], sizes = [8, 8], strides = [1, 1]} : vector<16x8xf32> to vector<8x8xf32>
    %11 = vector.extract_strided_slice %6 {offsets = [0, 0], sizes = [8, 8], strides = [1, 1]} : vector<8x32xf32> to vector<8x8xf32>
    %12 = vector.extract_strided_slice %7 {offsets = [0, 0], sizes = [8, 8], strides = [1, 1]} : vector<8x32xf32> to vector<8x8xf32>
    %cst_7 = arith.constant dense<0.000000e+00> : vector<8x8xf32>
    %13 = tpu.matmul %11, %12, %cst_7 {dimension_numbers = #tpu.dot_dimension_numbers<[1], [1], [0], [0], [0, 0, 1, 0], [], []>} : vector<8x8xf32>, vector<8x8xf32>, vector<8x8xf32> -> vector<8x8xf32>
    %cst_8 = arith.constant 0.353553385 : f32
    %14 = vector.broadcast %cst_8 : f32 to vector<8x8xf32>
    %15 = arith.mulf %13, %14 : vector<8x8xf32>
    %16 = arith.addf %15, %10 : vector<8x8xf32>
    %cst_9 = arith.constant dense<0xFF800000> : vector<8xf32>
    %17 = vector.multi_reduction <maximumf>, %16, %cst_9 [1] : vector<8x8xf32> to vector<8xf32>
    %18 = vector.shape_cast %17 : vector<8xf32> to vector<8x1xf32>
    %19 = vector.broadcast %18 : vector<8x1xf32> to vector<8x8xf32>
    %20 = arith.subf %16, %19 : vector<8x8xf32>
    %21 = math.exp %20 : vector<8x8xf32>
    %cst_10 = arith.constant dense<0.000000e+00> : vector<8xf32>
    %22 = vector.multi_reduction <add>, %21, %cst_10 [1] : vector<8x8xf32> to vector<8xf32>
    %23 = vector.shape_cast %22 : vector<8xf32> to vector<8x1xf32>
    %24 = tpu.reciprocal %23 {approx = true} : vector<8x1xf32> -> vector<8x1xf32>
    %25 = vector.broadcast %24 : vector<8x1xf32> to vector<8x8xf32>
    %26 = arith.mulf %21, %25 : vector<8x8xf32>
    %27 = arith.truncf %26 : vector<8x8xf32> to vector<8x8xbf16>
    %28 = vector.extract_strided_slice %9 {offsets = [0, 0], sizes = [8, 8], strides = [1, 1]} : vector<8x32xbf16> to vector<8x8xbf16>
    %cst_11 = arith.constant dense<0.000000e+00> : vector<8x8xf32>
    %29 = tpu.matmul %27, %28, %cst_11 {dimension_numbers = #tpu.dot_dimension_numbers<[1], [0], [0], [1], [0, 0, 1, 1], [], []>} : vector<8x8xbf16>, vector<8x8xbf16>, vector<8x8xf32> -> vector<8x8xf32>
    %30 = vector.extract_strided_slice %6 {offsets = [0, 8], sizes = [8, 8], strides = [1, 1]} : vector<8x32xf32> to vector<8x8xf32>
    %31 = vector.extract_strided_slice %7 {offsets = [0, 8], sizes = [8, 8], strides = [1, 1]} : vector<8x32xf32> to vector<8x8xf32>
    %cst_12 = arith.constant dense<0.000000e+00> : vector<8x8xf32>
    %32 = tpu.matmul %30, %31, %cst_12 {dimension_numbers = #tpu.dot_dimension_numbers<[1], [1], [0], [0], [0, 0, 1, 0], [], []>} : vector<8x8xf32>, vector<8x8xf32>, vector<8x8xf32> -> vector<8x8xf32>
    %cst_13 = arith.constant 0.353553385 : f32
    %33 = vector.broadcast %cst_13 : f32 to vector<8x8xf32>
    %34 = arith.mulf %32, %33 : vector<8x8xf32>
    %35 = arith.addf %34, %10 : vector<8x8xf32>
    %cst_14 = arith.constant dense<0xFF800000> : vector<8xf32>
    %36 = vector.multi_reduction <maximumf>, %35, %cst_14 [1] : vector<8x8xf32> to vector<8xf32>
    %37 = vector.shape_cast %36 : vector<8xf32> to vector<8x1xf32>
    %38 = vector.broadcast %37 : vector<8x1xf32> to vector<8x8xf32>
    %39 = arith.subf %35, %38 : vector<8x8xf32>
    %40 = math.exp %39 : vector<8x8xf32>
    %cst_15 = arith.constant dense<0.000000e+00> : vector<8xf32>
    %41 = vector.multi_reduction <add>, %40, %cst_15 [1] : vector<8x8xf32> to vector<8xf32>
    %42 = vector.shape_cast %41 : vector<8xf32> to vector<8x1xf32>
    %43 = tpu.reciprocal %42 {approx = true} : vector<8x1xf32> -> vector<8x1xf32>
    %44 = vector.broadcast %43 : vector<8x1xf32> to vector<8x8xf32>
    %45 = arith.mulf %40, %44 : vector<8x8xf32>
    %46 = arith.truncf %45 : vector<8x8xf32> to vector<8x8xbf16>
    %47 = vector.extract_strided_slice %9 {offsets = [0, 8], sizes = [8, 8], strides = [1, 1]} : vector<8x32xbf16> to vector<8x8xbf16>
    %cst_16 = arith.constant dense<0.000000e+00> : vector<8x8xf32>
    %48 = tpu.matmul %46, %47, %cst_16 {dimension_numbers = #tpu.dot_dimension_numbers<[1], [0], [0], [1], [0, 0, 1, 1], [], []>} : vector<8x8xbf16>, vector<8x8xbf16>, vector<8x8xf32> -> vector<8x8xf32>
    %49 = vector.extract_strided_slice %6 {offsets = [0, 16], sizes = [8, 8], strides = [1, 1]} : vector<8x32xf32> to vector<8x8xf32>
    %50 = vector.extract_strided_slice %7 {offsets = [0, 16], sizes = [8, 8], strides = [1, 1]} : vector<8x32xf32> to vector<8x8xf32>
    %cst_17 = arith.constant dense<0.000000e+00> : vector<8x8xf32>
    %51 = tpu.matmul %49, %50, %cst_17 {dimension_numbers = #tpu.dot_dimension_numbers<[1], [1], [0], [0], [0, 0, 1, 0], [], []>} : vector<8x8xf32>, vector<8x8xf32>, vector<8x8xf32> -> vector<8x8xf32>
    %cst_18 = arith.constant 0.353553385 : f32
    %52 = vector.broadcast %cst_18 : f32 to vector<8x8xf32>
    %53 = arith.mulf %51, %52 : vector<8x8xf32>
    %54 = arith.addf %53, %10 : vector<8x8xf32>
    %cst_19 = arith.constant dense<0xFF800000> : vector<8xf32>
    %55 = vector.multi_reduction <maximumf>, %54, %cst_19 [1] : vector<8x8xf32> to vector<8xf32>
    %56 = vector.shape_cast %55 : vector<8xf32> to vector<8x1xf32>
    %57 = vector.broadcast %56 : vector<8x1xf32> to vector<8x8xf32>
    %58 = arith.subf %54, %57 : vector<8x8xf32>
    %59 = math.exp %58 : vector<8x8xf32>
    %cst_20 = arith.constant dense<0.000000e+00> : vector<8xf32>
    %60 = vector.multi_reduction <add>, %59, %cst_20 [1] : vector<8x8xf32> to vector<8xf32>
    %61 = vector.shape_cast %60 : vector<8xf32> to vector<8x1xf32>
    %62 = tpu.reciprocal %61 {approx = true} : vector<8x1xf32> -> vector<8x1xf32>
    %63 = vector.broadcast %62 : vector<8x1xf32> to vector<8x8xf32>
    %64 = arith.mulf %59, %63 : vector<8x8xf32>
    %65 = arith.truncf %64 : vector<8x8xf32> to vector<8x8xbf16>
    %66 = vector.extract_strided_slice %9 {offsets = [0, 16], sizes = [8, 8], strides = [1, 1]} : vector<8x32xbf16> to vector<8x8xbf16>
    %cst_21 = arith.constant dense<0.000000e+00> : vector<8x8xf32>
    %67 = tpu.matmul %65, %66, %cst_21 {dimension_numbers = #tpu.dot_dimension_numbers<[1], [0], [0], [1], [0, 0, 1, 1], [], []>} : vector<8x8xbf16>, vector<8x8xbf16>, vector<8x8xf32> -> vector<8x8xf32>
    %68 = vector.extract_strided_slice %6 {offsets = [0, 24], sizes = [8, 8], strides = [1, 1]} : vector<8x32xf32> to vector<8x8xf32>
    %69 = vector.extract_strided_slice %7 {offsets = [0, 24], sizes = [8, 8], strides = [1, 1]} : vector<8x32xf32> to vector<8x8xf32>
    %cst_22 = arith.constant dense<0.000000e+00> : vector<8x8xf32>
    %70 = tpu.matmul %68, %69, %cst_22 {dimension_numbers = #tpu.dot_dimension_numbers<[1], [1], [0], [0], [0, 0, 1, 0], [], []>} : vector<8x8xf32>, vector<8x8xf32>, vector<8x8xf32> -> vector<8x8xf32>
    %cst_23 = arith.constant 0.353553385 : f32
    %71 = vector.broadcast %cst_23 : f32 to vector<8x8xf32>
    %72 = arith.mulf %70, %71 : vector<8x8xf32>
    %73 = arith.addf %72, %10 : vector<8x8xf32>
    %cst_24 = arith.constant dense<0xFF800000> : vector<8xf32>
    %74 = vector.multi_reduction <maximumf>, %73, %cst_24 [1] : vector<8x8xf32> to vector<8xf32>
    %75 = vector.shape_cast %74 : vector<8xf32> to vector<8x1xf32>
    %76 = vector.broadcast %75 : vector<8x1xf32> to vector<8x8xf32>
    %77 = arith.subf %73, %76 : vector<8x8xf32>
    %78 = math.exp %77 : vector<8x8xf32>
    %cst_25 = arith.constant dense<0.000000e+00> : vector<8xf32>
    %79 = vector.multi_reduction <add>, %78, %cst_25 [1] : vector<8x8xf32> to vector<8xf32>
    %80 = vector.shape_cast %79 : vector<8xf32> to vector<8x1xf32>
    %81 = tpu.reciprocal %80 {approx = true} : vector<8x1xf32> -> vector<8x1xf32>
    %82 = vector.broadcast %81 : vector<8x1xf32> to vector<8x8xf32>
    %83 = arith.mulf %78, %82 : vector<8x8xf32>
    %84 = arith.truncf %83 : vector<8x8xf32> to vector<8x8xbf16>
    %85 = vector.extract_strided_slice %9 {offsets = [0, 24], sizes = [8, 8], strides = [1, 1]} : vector<8x32xbf16> to vector<8x8xbf16>
    %cst_26 = arith.constant dense<0.000000e+00> : vector<8x8xf32>
    %86 = tpu.matmul %84, %85, %cst_26 {dimension_numbers = #tpu.dot_dimension_numbers<[1], [0], [0], [1], [0, 0, 1, 1], [], []>} : vector<8x8xbf16>, vector<8x8xbf16>, vector<8x8xf32> -> vector<8x8xf32>
    %87 = tpu.concatenate %26, %45, %64, %83 in 1 : vector<8x8xf32>, vector<8x8xf32>, vector<8x8xf32>, vector<8x8xf32> -> vector<8x32xf32>
    %88 = tpu.concatenate %29, %48, %67, %86 in 1 : vector<8x8xf32>, vector<8x8xf32>, vector<8x8xf32>, vector<8x8xf32> -> vector<8x32xf32>
    %89 = vector.extract_strided_slice %5 {offsets = [8, 0], sizes = [8, 32], strides = [1, 1]} : vector<16x96xf32> to vector<8x32xf32>
    %90 = vector.extract_strided_slice %5 {offsets = [8, 32], sizes = [8, 32], strides = [1, 1]} : vector<16x96xf32> to vector<8x32xf32>
    %91 = vector.extract_strided_slice %5 {offsets = [8, 64], sizes = [8, 32], strides = [1, 1]} : vector<16x96xf32> to vector<8x32xf32>
    %92 = arith.truncf %91 : vector<8x32xf32> to vector<8x32xbf16>
    %93 = vector.extract_strided_slice %1 {offsets = [8, 0], sizes = [8, 8], strides = [1, 1]} : vector<16x8xf32> to vector<8x8xf32>
    %94 = vector.extract_strided_slice %89 {offsets = [0, 0], sizes = [8, 8], strides = [1, 1]} : vector<8x32xf32> to vector<8x8xf32>
    %95 = vector.extract_strided_slice %90 {offsets = [0, 0], sizes = [8, 8], strides = [1, 1]} : vector<8x32xf32> to vector<8x8xf32>
    %cst_27 = arith.constant dense<0.000000e+00> : vector<8x8xf32>
    %96 = tpu.matmul %94, %95, %cst_27 {dimension_numbers = #tpu.dot_dimension_numbers<[1], [1], [0], [0], [0, 0, 1, 0], [], []>} : vector<8x8xf32>, vector<8x8xf32>, vector<8x8xf32> -> vector<8x8xf32>
    %cst_28 = arith.constant 0.353553385 : f32
    %97 = vector.broadcast %cst_28 : f32 to vector<8x8xf32>
    %98 = arith.mulf %96, %97 : vector<8x8xf32>
    %99 = arith.addf %98, %93 : vector<8x8xf32>
    %cst_29 = arith.constant dense<0xFF800000> : vector<8xf32>
    %100 = vector.multi_reduction <maximumf>, %99, %cst_29 [1] : vector<8x8xf32> to vector<8xf32>
    %101 = vector.shape_cast %100 : vector<8xf32> to vector<8x1xf32>
    %102 = vector.broadcast %101 : vector<8x1xf32> to vector<8x8xf32>
    %103 = arith.subf %99, %102 : vector<8x8xf32>
    %104 = math.exp %103 : vector<8x8xf32>
    %cst_30 = arith.constant dense<0.000000e+00> : vector<8xf32>
    %105 = vector.multi_reduction <add>, %104, %cst_30 [1] : vector<8x8xf32> to vector<8xf32>
    %106 = vector.shape_cast %105 : vector<8xf32> to vector<8x1xf32>
    %107 = tpu.reciprocal %106 {approx = true} : vector<8x1xf32> -> vector<8x1xf32>
    %108 = vector.broadcast %107 : vector<8x1xf32> to vector<8x8xf32>
    %109 = arith.mulf %104, %108 : vector<8x8xf32>
    %110 = arith.truncf %109 : vector<8x8xf32> to vector<8x8xbf16>
    %111 = vector.extract_strided_slice %92 {offsets = [0, 0], sizes = [8, 8], strides = [1, 1]} : vector<8x32xbf16> to vector<8x8xbf16>
    %cst_31 = arith.constant dense<0.000000e+00> : vector<8x8xf32>
    %112 = tpu.matmul %110, %111, %cst_31 {dimension_numbers = #tpu.dot_dimension_numbers<[1], [0], [0], [1], [0, 0, 1, 1], [], []>} : vector<8x8xbf16>, vector<8x8xbf16>, vector<8x8xf32> -> vector<8x8xf32>
    %113 = vector.extract_strided_slice %89 {offsets = [0, 8], sizes = [8, 8], strides = [1, 1]} : vector<8x32xf32> to vector<8x8xf32>
    %114 = vector.extract_strided_slice %90 {offsets = [0, 8], sizes = [8, 8], strides = [1, 1]} : vector<8x32xf32> to vector<8x8xf32>
    %cst_32 = arith.constant dense<0.000000e+00> : vector<8x8xf32>
    %115 = tpu.matmul %113, %114, %cst_32 {dimension_numbers = #tpu.dot_dimension_numbers<[1], [1], [0], [0], [0, 0, 1, 0], [], []>} : vector<8x8xf32>, vector<8x8xf32>, vector<8x8xf32> -> vector<8x8xf32>
    %cst_33 = arith.constant 0.353553385 : f32
    %116 = vector.broadcast %cst_33 : f32 to vector<8x8xf32>
    %117 = arith.mulf %115, %116 : vector<8x8xf32>
    %118 = arith.addf %117, %93 : vector<8x8xf32>
    %cst_34 = arith.constant dense<0xFF800000> : vector<8xf32>
    %119 = vector.multi_reduction <maximumf>, %118, %cst_34 [1] : vector<8x8xf32> to vector<8xf32>
    %120 = vector.shape_cast %119 : vector<8xf32> to vector<8x1xf32>
    %121 = vector.broadcast %120 : vector<8x1xf32> to vector<8x8xf32>
    %122 = arith.subf %118, %121 : vector<8x8xf32>
    %123 = math.exp %122 : vector<8x8xf32>
    %cst_35 = arith.constant dense<0.000000e+00> : vector<8xf32>
    %124 = vector.multi_reduction <add>, %123, %cst_35 [1] : vector<8x8xf32> to vector<8xf32>
    %125 = vector.shape_cast %124 : vector<8xf32> to vector<8x1xf32>
    %126 = tpu.reciprocal %125 {approx = true} : vector<8x1xf32> -> vector<8x1xf32>
    %127 = vector.broadcast %126 : vector<8x1xf32> to vector<8x8xf32>
    %128 = arith.mulf %123, %127 : vector<8x8xf32>
    %129 = arith.truncf %128 : vector<8x8xf32> to vector<8x8xbf16>
    %130 = vector.extract_strided_slice %92 {offsets = [0, 8], sizes = [8, 8], strides = [1, 1]} : vector<8x32xbf16> to vector<8x8xbf16>
    %cst_36 = arith.constant dense<0.000000e+00> : vector<8x8xf32>
    %131 = tpu.matmul %129, %130, %cst_36 {dimension_numbers = #tpu.dot_dimension_numbers<[1], [0], [0], [1], [0, 0, 1, 1], [], []>} : vector<8x8xbf16>, vector<8x8xbf16>, vector<8x8xf32> -> vector<8x8xf32>
    %132 = vector.extract_strided_slice %89 {offsets = [0, 16], sizes = [8, 8], strides = [1, 1]} : vector<8x32xf32> to vector<8x8xf32>
    %133 = vector.extract_strided_slice %90 {offsets = [0, 16], sizes = [8, 8], strides = [1, 1]} : vector<8x32xf32> to vector<8x8xf32>
    %cst_37 = arith.constant dense<0.000000e+00> : vector<8x8xf32>
    %134 = tpu.matmul %132, %133, %cst_37 {dimension_numbers = #tpu.dot_dimension_numbers<[1], [1], [0], [0], [0, 0, 1, 0], [], []>} : vector<8x8xf32>, vector<8x8xf32>, vector<8x8xf32> -> vector<8x8xf32>
    %cst_38 = arith.constant 0.353553385 : f32
    %135 = vector.broadcast %cst_38 : f32 to vector<8x8xf32>
    %136 = arith.mulf %134, %135 : vector<8x8xf32>
    %137 = arith.addf %136, %93 : vector<8x8xf32>
    %cst_39 = arith.constant dense<0xFF800000> : vector<8xf32>
    %138 = vector.multi_reduction <maximumf>, %137, %cst_39 [1] : vector<8x8xf32> to vector<8xf32>
    %139 = vector.shape_cast %138 : vector<8xf32> to vector<8x1xf32>
    %140 = vector.broadcast %139 : vector<8x1xf32> to vector<8x8xf32>
    %141 = arith.subf %137, %140 : vector<8x8xf32>
    %142 = math.exp %141 : vector<8x8xf32>
    %cst_40 = arith.constant dense<0.000000e+00> : vector<8xf32>
    %143 = vector.multi_reduction <add>, %142, %cst_40 [1] : vector<8x8xf32> to vector<8xf32>
    %144 = vector.shape_cast %143 : vector<8xf32> to vector<8x1xf32>
    %145 = tpu.reciprocal %144 {approx = true} : vector<8x1xf32> -> vector<8x1xf32>
    %146 = vector.broadcast %145 : vector<8x1xf32> to vector<8x8xf32>
    %147 = arith.mulf %142, %146 : vector<8x8xf32>
    %148 = arith.truncf %147 : vector<8x8xf32> to vector<8x8xbf16>
    %149 = vector.extract_strided_slice %92 {offsets = [0, 16], sizes = [8, 8], strides = [1, 1]} : vector<8x32xbf16> to vector<8x8xbf16>
    %cst_41 = arith.constant dense<0.000000e+00> : vector<8x8xf32>
    %150 = tpu.matmul %148, %149, %cst_41 {dimension_numbers = #tpu.dot_dimension_numbers<[1], [0], [0], [1], [0, 0, 1, 1], [], []>} : vector<8x8xbf16>, vector<8x8xbf16>, vector<8x8xf32> -> vector<8x8xf32>
    %151 = vector.extract_strided_slice %89 {offsets = [0, 24], sizes = [8, 8], strides = [1, 1]} : vector<8x32xf32> to vector<8x8xf32>
    %152 = vector.extract_strided_slice %90 {offsets = [0, 24], sizes = [8, 8], strides = [1, 1]} : vector<8x32xf32> to vector<8x8xf32>
    %cst_42 = arith.constant dense<0.000000e+00> : vector<8x8xf32>
    %153 = tpu.matmul %151, %152, %cst_42 {dimension_numbers = #tpu.dot_dimension_numbers<[1], [1], [0], [0], [0, 0, 1, 0], [], []>} : vector<8x8xf32>, vector<8x8xf32>, vector<8x8xf32> -> vector<8x8xf32>
    %cst_43 = arith.constant 0.353553385 : f32
    %154 = vector.broadcast %cst_43 : f32 to vector<8x8xf32>
    %155 = arith.mulf %153, %154 : vector<8x8xf32>
    %156 = arith.addf %155, %93 : vector<8x8xf32>
    %cst_44 = arith.constant dense<0xFF800000> : vector<8xf32>
    %157 = vector.multi_reduction <maximumf>, %156, %cst_44 [1] : vector<8x8xf32> to vector<8xf32>
    %158 = vector.shape_cast %157 : vector<8xf32> to vector<8x1xf32>
    %159 = vector.broadcast %158 : vector<8x1xf32> to vector<8x8xf32>
    %160 = arith.subf %156, %159 : vector<8x8xf32>
    %161 = math.exp %160 : vector<8x8xf32>
    %cst_45 = arith.constant dense<0.000000e+00> : vector<8xf32>
    %162 = vector.multi_reduction <add>, %161, %cst_45 [1] : vector<8x8xf32> to vector<8xf32>
    %163 = vector.shape_cast %162 : vector<8xf32> to vector<8x1xf32>
    %164 = tpu.reciprocal %163 {approx = true} : vector<8x1xf32> -> vector<8x1xf32>
    %165 = vector.broadcast %164 : vector<8x1xf32> to vector<8x8xf32>
    %166 = arith.mulf %161, %165 : vector<8x8xf32>
    %167 = arith.truncf %166 : vector<8x8xf32> to vector<8x8xbf16>
    %168 = vector.extract_strided_slice %92 {offsets = [0, 24], sizes = [8, 8], strides = [1, 1]} : vector<8x32xbf16> to vector<8x8xbf16>
    %cst_46 = arith.constant dense<0.000000e+00> : vector<8x8xf32>
    %169 = tpu.matmul %167, %168, %cst_46 {dimension_numbers = #tpu.dot_dimension_numbers<[1], [0], [0], [1], [0, 0, 1, 1], [], []>} : vector<8x8xbf16>, vector<8x8xbf16>, vector<8x8xf32> -> vector<8x8xf32>
    %170 = tpu.concatenate %109, %128, %147, %166 in 1 : vector<8x8xf32>, vector<8x8xf32>, vector<8x8xf32>, vector<8x8xf32> -> vector<8x32xf32>
    %171 = tpu.concatenate %112, %131, %150, %169 in 1 : vector<8x8xf32>, vector<8x8xf32>, vector<8x8xf32>, vector<8x8xf32> -> vector<8x32xf32>
    %172 = tpu.concatenate %87, %170 in 0 : vector<8x32xf32>, vector<8x32xf32> -> vector<16x32xf32>
    %c0_47 = arith.constant 0 : index
    %c0_48 = arith.constant 0 : index
    %173 = vector.load %arg9[%c0_47, %c0_48] : memref<16x32xf32, #tpu.memory_space<vmem>>, vector<16x32xf32>
    tpu.vector_store %arg9[%c0_47, %c0_48], %172 {strides = array<i32>} : memref<16x32xf32, #tpu.memory_space<vmem>>, vector<16x32xf32>,
    %174 = tpu.concatenate %88, %171 in 0 : vector<8x32xf32>, vector<8x32xf32> -> vector<16x32xf32>
    %175 = arith.truncf %174 : vector<16x32xf32> to vector<16x32xbf16>
    %c0_49 = arith.constant 0 : index
    %c0_50 = arith.constant 0 : index
    %176 = vector.load %arg5[%c0_49, %c0_50] : memref<32x32xbf16, #tpu.memory_space<vmem>>, vector<32x32xbf16>
    %cst_51 = arith.constant dense<0.000000e+00> : vector<16x32xf32>
    %177 = tpu.matmul %175, %176, %cst_51 {dimension_numbers = #tpu.dot_dimension_numbers<[1], [0], [0], [1], [0, 0, 1, 1], [], []>} : vector<16x32xbf16>, vector<32x32xbf16>, vector<16x32xf32> -> vector<16x32xf32>
    %178 = arith.addf %0, %177 : vector<16x32xf32>
    %179 = arith.truncf %178 : vector<16x32xf32> to vector<16x32xbf16>
    %c0_52 = arith.constant 0 : index
    %c0_53 = arith.constant 0 : index
    %180 = vector.load %arg6[%c0_52, %c0_53] : memref<32x32xbf16, #tpu.memory_space<vmem>>, vector<32x32xbf16>
    %cst_54 = arith.constant dense<0.000000e+00> : vector<16x32xf32>
    %181 = tpu.matmul %179, %180, %cst_54 {dimension_numbers = #tpu.dot_dimension_numbers<[1], [0], [0], [1], [0, 0, 1, 1], [], []>} : vector<16x32xbf16>, vector<32x32xbf16>, vector<16x32xf32> -> vector<16x32xf32>
    %c0_55 = arith.constant 0 : index
    %c0_56 = arith.constant 0 : index
    %182 = vector.load %arg7[%c0_55, %c0_56] : memref<1x32xf32, #tpu.memory_space<vmem>>, vector<1x32xf32>
    %183 = vector.broadcast %182 : vector<1x32xf32> to vector<16x32xf32>
    %184 = arith.addf %181, %183 : vector<16x32xf32>
    %185 = math.tanh %184 : vector<16x32xf32>
    %c0_57 = arith.constant 0 : index
    %c0_58 = arith.constant 0 : index
    %186 = vector.load %arg8[%c0_57, %c0_58] : memref<32x1xf32, #tpu.memory_space<vmem>>, vector<32x1xf32>
    %cst_59 = arith.constant dense<0.000000e+00> : vector<16x1xf32>
    %187 = tpu.matmul %185, %186, %cst_59 {dimension_numbers = #tpu.dot_dimension_numbers<[1], [0], [0], [1], [0, 0, 1, 1], [], []>} : vector<16x32xf32>, vector<32x1xf32>, vector<16x1xf32> -> vector<16x1xf32>
    %188 = arith.addf %187, %2 : vector<16x1xf32>
    %189 = vector.extract_strided_slice %188 {offsets = [0, 0], sizes = [8, 1], strides = [1, 1]} : vector<16x1xf32> to vector<8x1xf32>
    %cst_60 = arith.constant dense<0xFF800000> : vector<1xf32>
    %190 = vector.multi_reduction <maximumf>, %189, %cst_60 [0] : vector<8x1xf32> to vector<1xf32>
    %191 = vector.shape_cast %190 : vector<1xf32> to vector<1x1xf32>
    %192 = vector.broadcast %191 : vector<1x1xf32> to vector<8x1xf32>
    %193 = arith.subf %189, %192 : vector<8x1xf32>
    %194 = math.exp %193 : vector<8x1xf32>
    %cst_61 = arith.constant dense<0.000000e+00> : vector<1xf32>
    %195 = vector.multi_reduction <add>, %194, %cst_61 [0] : vector<8x1xf32> to vector<1xf32>
    %196 = vector.shape_cast %195 : vector<1xf32> to vector<1x1xf32>
    %197 = tpu.reciprocal %196 {approx = true} : vector<1x1xf32> -> vector<1x1xf32>
    %198 = vector.broadcast %197 : vector<1x1xf32> to vector<8x1xf32>
    %199 = arith.mulf %194, %198 : vector<8x1xf32>
    %200 = vector.extract_strided_slice %178 {offsets = [0, 0], sizes = [8, 32], strides = [1, 1]} : vector<16x32xf32> to vector<8x32xf32>
    %cst_62 = arith.constant dense<0.000000e+00> : vector<1x32xf32>
    %201 = tpu.matmul %199, %200, %cst_62 {dimension_numbers = #tpu.dot_dimension_numbers<[0], [0], [1], [1], [0, 1, 1, 1], [], []>} : vector<8x1xf32>, vector<8x32xf32>, vector<1x32xf32> -> vector<1x32xf32>
    %202 = vector.extract_strided_slice %188 {offsets = [8, 0], sizes = [8, 1], strides = [1, 1]} : vector<16x1xf32> to vector<8x1xf32>
    %cst_63 = arith.constant dense<0xFF800000> : vector<1xf32>
    %203 = vector.multi_reduction <maximumf>, %202, %cst_63 [0] : vector<8x1xf32> to vector<1xf32>
    %204 = vector.shape_cast %203 : vector<1xf32> to vector<1x1xf32>
    %205 = vector.broadcast %204 : vector<1x1xf32> to vector<8x1xf32>
    %206 = arith.subf %202, %205 : vector<8x1xf32>
    %207 = math.exp %206 : vector<8x1xf32>
    %cst_64 = arith.constant dense<0.000000e+00> : vector<1xf32>
    %208 = vector.multi_reduction <add>, %207, %cst_64 [0] : vector<8x1xf32> to vector<1xf32>
    %209 = vector.shape_cast %208 : vector<1xf32> to vector<1x1xf32>
    %210 = tpu.reciprocal %209 {approx = true} : vector<1x1xf32> -> vector<1x1xf32>
    %211 = vector.broadcast %210 : vector<1x1xf32> to vector<8x1xf32>
    %212 = arith.mulf %207, %211 : vector<8x1xf32>
    %213 = vector.extract_strided_slice %178 {offsets = [8, 0], sizes = [8, 32], strides = [1, 1]} : vector<16x32xf32> to vector<8x32xf32>
    %cst_65 = arith.constant dense<0.000000e+00> : vector<1x32xf32>
    %214 = tpu.matmul %212, %213, %cst_65 {dimension_numbers = #tpu.dot_dimension_numbers<[0], [0], [1], [1], [0, 1, 1, 1], [], []>} : vector<8x1xf32>, vector<8x32xf32>, vector<1x32xf32> -> vector<1x32xf32>
    %215 = tpu.concatenate %201, %214 in 0 : vector<1x32xf32>, vector<1x32xf32> -> vector<2x32xf32>
    %c0_66 = arith.constant 0 : index
    %c0_67 = arith.constant 0 : index
    %216 = vector.load %arg10[%c0_66, %c0_67] : memref<2x32xf32, #tpu.memory_space<vmem>>, vector<2x32xf32>
    tpu.vector_store %arg10[%c0_66, %c0_67], %215 {strides = array<i32>} : memref<2x32xf32, #tpu.memory_space<vmem>>, vector<2x32xf32>,
    %217 = tpu.concatenate %199, %212 in 0 : vector<8x1xf32>, vector<8x1xf32> -> vector<16x1xf32>
    %c0_68 = arith.constant 0 : index
    %c0_69 = arith.constant 0 : index
    %218 = vector.load %arg11[%c0_68, %c0_69] : memref<16x1xf32, #tpu.memory_space<vmem>>, vector<16x1xf32>
    tpu.vector_store %arg11[%c0_68, %c0_69], %217 {strides = array<i32>} : memref<16x1xf32, #tpu.memory_space<vmem>>, vector<16x1xf32>,
    return
  }
  func.func @transform_0(%arg0: i32) -> (i32, i32) {
    %c0_i32 = arith.constant 0 : i32
    %c0_i32_0 = arith.constant 0 : i32
    return %arg0, %c0_i32 : i32, i32
  }
  func.func @transform_1(%arg0: i32) -> (i32, i32) {
    %c0_i32 = arith.constant 0 : i32
    %c0_i32_0 = arith.constant 0 : i32
    return %arg0, %c0_i32 : i32, i32
  }
  func.func @transform_2(%arg0: i32) -> (i32, i32) {
    %c0_i32 = arith.constant 0 : i32
    %c0_i32_0 = arith.constant 0 : i32
    return %arg0, %c0_i32 : i32, i32
  }
  func.func @transform_3(%arg0: i32) -> (i32, i32) {
    %c0_i32 = arith.constant 0 : i32
    %c0_i32_0 = arith.constant 0 : i32
    %c0_i32_1 = arith.constant 0 : i32
    return %c0_i32, %c0_i32_0 : i32, i32
  }
  func.func @transform_4(%arg0: i32) -> (i32, i32) {
    %c0_i32 = arith.constant 0 : i32
    %c0_i32_0 = arith.constant 0 : i32
    %c0_i32_1 = arith.constant 0 : i32
    return %c0_i32, %c0_i32_0 : i32, i32
  }
  func.func @transform_5(%arg0: i32) -> (i32, i32) {
    %c0_i32 = arith.constant 0 : i32
    %c0_i32_0 = arith.constant 0 : i32
    %c0_i32_1 = arith.constant 0 : i32
    return %c0_i32, %c0_i32_0 : i32, i32
  }
  func.func @transform_6(%arg0: i32) -> (i32, i32) {
    %c0_i32 = arith.constant 0 : i32
    %c0_i32_0 = arith.constant 0 : i32
    %c0_i32_1 = arith.constant 0 : i32
    return %c0_i32, %c0_i32_0 : i32, i32
  }
  func.func @transform_7(%arg0: i32) -> (i32, i32) {
    %c0_i32 = arith.constant 0 : i32
    %c0_i32_0 = arith.constant 0 : i32
    %c0_i32_1 = arith.constant 0 : i32
    return %c0_i32, %c0_i32_0 : i32, i32
  }
  func.func @transform_8(%arg0: i32) -> (i32, i32) {
    %c0_i32 = arith.constant 0 : i32
    %c0_i32_0 = arith.constant 0 : i32
    return %arg0, %c0_i32 : i32, i32
  }
  func.func @transform_9(%arg0: i32) -> (i32, i32) {
    %c0_i32 = arith.constant 0 : i32
    %c0_i32_0 = arith.constant 0 : i32
    return %arg0, %c0_i32 : i32, i32
  }
  func.func @transform_10(%arg0: i32) -> (i32, i32) {
    %c0_i32 = arith.constant 0 : i32
    %c0_i32_0 = arith.constant 0 : i32
    return %arg0, %c0_i32 : i32, i32
  }
}

</mosaic_0001>

<bundles_post_ra>
// kernel: candidate_news_semantic.1
= control target key start
LH: loop header
LB: loop body
LE: loop exit
PB: predicated region body
PF: predicated region fallthrough
CT: control target
= control target key end

     0   :  { %v2124_v1 = vmov 0.0   ;;  %vm2125_vm0 = vmmov 0   ;;  %s2554_s0 = inlined_call_operand.vmem [shape: f32[16,32], index: 0, kind: input, shape index: {}]   ;;  %s2555_s1 = inlined_call_operand.vmem [shape: f32[16,8], index: 1, kind: input, shape index: {}]   ;;  %s2556_s2 = inlined_call_operand.vmem [shape: f32[16,1], index: 2, kind: input, shape index: {}]   ;;  %s2557_s3 = inlined_call_operand.vmem [shape: bf16[32,96], index: 3, kind: input, shape index: {}]   ;;  %s2558_s4 = inlined_call_operand.vmem [shape: bf16[32,32], index: 4, kind: input, shape index: {}]   ;;  %s2559_s5 = inlined_call_operand.vmem [shape: bf16[32,32], index: 5, kind: input, shape index: {}]   ;;  %s2560_s6 = inlined_call_operand.vmem [shape: f32[1,32], index: 6, kind: input, shape index: {}]   ;;  %s2561_s7 = inlined_call_operand.vmem [shape: f32[32,1], index: 7, kind: input, shape index: {}]   ;;  %s2562_s8 = inlined_call_operand.vmem [shape: f32[16,32], index: 8, kind: output, shape index: {0}]   ;;  %s2563_s9 = inlined_call_operand.hbm [shape: f32[2,32], index: 9, kind: output, shape index: {1}]   ;;  %s2564_s10 = inlined_call_operand.vmem [shape: f32[16,1], index: 10, kind: output, shape index: {2}]  }
   0x1   :  { %v2050_v0 = vld [vmem:[%s2557_s3] sm:$0xff]   ;;  %1877 = vmatprep.subr.bf16.mxu0 %v2124_v1  ;;  %v2051_v2 = vld [vmem:[%s2557_s3 + $0x8] sm:$0xff]   ;;  %1885 = vmatprep.subr.mxu1 %v2124_v1 }
   0x2   :  { %1878 = vmatpush3.bf16.msra.mxu0 %v2050_v0  ;;  %1881 = vmatprep.mubr.msk.bf16.mxu0 %vm2125_vm0, %v2124_v1  ;;  %v2209_v3 = vld [vmem:[%s2554_s0] sm:$0xff]  ;;  %v2214_v4 = vld [vmem:[%s2554_s0 + $0x8] sm:$0xff] }
   0x3   :  { %1879 = vmatprep.subr.bf16.mxu0 %v2124_v1  ;;  %1887 = vmatprep.mubr.msk.f32.mxu1 %vm2125_vm0, %v2124_v1  ;;  %v40_v5 = vpack.c.bf16 %v2214_v4, %v2209_v3 }
   0x4   :  { %16 = vsyncpa [#allocation3], 0  ;;  %vm57_vm1 = vcmask 261120   ;;  %s2126_s0 = smov 120   ;;  %s2127_s3 = smov 96   ;;  %vm106_vm2 = vcmask 64512  }
   0x5   :  { %s2128_s21 = smov 88   ;;  %v2249_v14 = vld [vmem:[%s2555_s1] sm:$0xff]  ;;  %s2129_s24 = smov 56   ;;  %vm201_vm3 = vcmask 1043456   ;;  %vm678_vm4 = vcmask 130048   ;;  %vm680_vm5 = vcmask 195584  }
   0x6   :  { %1880 = vmatpush3.bf16.msra.mxu0 %v2051_v2  ;;  %s2130_s25 = smov 80   ;;  %s2131_s26 = smov 112   ;;  %vm1508_vm6 = vcmask 7168   ;;  %vm1760_vm7 = vcmask 1040384   ;;  %vm1762_vm8 = vcmask 254976  }
   0x7   :  { %1896 = vmatprep.subr.mxu0 %v2124_v1  ;;  %s2132_s27 = smov 64   ;;  %s2133_s28 = smov 72  }
   0x8   :  { %s2134_s29 = smov 104   ;;  %s2135_s30 = smov 40  }
   0x9   :  { %1882 = vmatmul.mubr.msk.bf16.vlgmr.msra.gmra.mrb[0].mxu0 %vm57_vm1, %v40_v5  ;;  %s2136_s11 = smov 48   ;;  %s2138_s16 = smov 16  }
   0xa   :  { %1898 = vmatprep.mubr.msk.f32.mxu0 %vm2125_vm0, %v2124_v1  ;;  %s2140_s17 = smov [#allocation2]  }
   0xb   :  { %s1774_s18 = sshll.u32 %s2140_s17, 4  ;;  %s1775_s18 = int_to_ptr.vmem [resolvable:$true] %s1774_s18 }
   0xc   :  { %s2100_s19 = scalar_lea.vmem %s1775_s18, 32  ;;  %p2105_p1 = scmp.lt.s32.totalorder %s1775_s18, %s1775_s18 }
   0xd   :  { %p2101_p0 = scmp.ne.s32.totalorder %s1775_s18, %s2100_s19  ;;  %p2106_p2 = scmp.lt.s32.totalorder %s2100_s19, %s2100_s19 }
   0xf   :  { %p2107_p3 = por %p2106_p2, %p2105_p1 }
  0x11   :  { %p2108_p4 = pnand %p2107_p3, %p2101_p0 }
  0xdc   :  { %v2225_v6 = vpop.f32.mrb[0].mxu0 }
  0xdd   :  { %245 = vrot.lane.b32.xlu1 %v2225_v6, %s2126_s0  ;;  %104 = vrot.lane.b32.xlu0 %v2225_v6, %s2127_s3  ;;  %v1883_v7 = vpop.f32.mrb[1].mxu0  ;;  %v2257_v24 = vpack.c.bf16 %v2225_v6, %v2225_v6 }
  0xde   :  { %v2231_v8 = vpop.f32.mrb[2].mxu0 }
  0xdf   :  { %v1884_v9 = vpop.f32.mrb[3].mxu0 }
  0xe1   :  { %247 = vrot.lane.b32.xlu0 %v2225_v6, %s2128_s21 }
 0x14f   :  { %v105_v10 = vpop.permute.xlu0 %104  ;;  %v246_v12 = vpop.permute.xlu1 %245 }
 0x150   :  { %1886 = vmatpush3.xpose.msk.msra.mxu1 %vm106_vm2, %v105_v10 }
 0x151   :  { %1890 = vmatprep.subr.bf16.mxu1 %v2124_v1 }
 0x153   :  { %1888 = vmatmul.mubr.msk.f32.vlgmr.msra.gmra.mrb[0].mxu1 %vm106_vm2, %v2225_v6  ;;  %v248_v11 = vpop.permute.xlu0 %247 }
 0x154   :  { %1897 = vmatpush3.xpose.msk.msra.mxu0 %vm106_vm2, %v248_v11  ;;  %1892 = vmatprep.mubr.msk.bf16.mxu1 %vm2125_vm0, %v2124_v1 }
 0x155   :  { %1907 = vmatprep.subr.mxu0 %v2124_v1 }
 0x157   :  { %1899 = vmatmul.mubr.msk.f32.vlgmr.msra.gmra.mrb[4].mxu0 %vm106_vm2, %v246_v12 }
 0x158   :  { %1909 = vmatprep.mubr.msk.f32.mxu0 %vm2125_vm0, %v2124_v1 }
 0x226   :  { %v177_v13 = vpop.f32.mrb[0].mxu1 }
 0x227   :  { %v181_v15 = vmul.f32 0.35355338, %v177_v13  ;;  %v1889_v16 = vpop.f32.mrb[1].mxu1 }
 0x229   :  { %v182_v17 = vadd.f32 %v181_v15, %v2249_v14 }
 0x22a   :  { %v319_v18 = vpop.f32.mrb[4].mxu0 }
 0x22b   :  { %v323_v19 = vmul.f32 0.35355338, %v319_v18  ;;  %v1900_v20 = vpop.f32.mrb[5].mxu0  ;;  %v183_v21 = vsel %vm106_vm2, %v182_v17, -inf }
 0x22c   :  { %184 = vmax.xlane.f32.xlu1 %v183_v21 }
 0x22d   :  { %v324_v22 = vadd.f32 %v323_v19, %v2249_v14 }
 0x22f   :  { %v325_v23 = vsel %vm106_vm2, %v324_v22, -inf }
 0x230   :  { %326 = vmax.xlane.f32.xlu0 %v325_v23 }
 0x23d   :  { %337 = vrot.lane.b32.xlu1 %v2257_v24, %s2129_s24 }
 0x241   :  { %387 = vrot.lane.b32.xlu1 %v2225_v6, %s2130_s25 }
 0x2b9   :  { %v185_v25 = vpop.xlane.xlu1 %184 }
 0x2ba   :  { %v186_v26 = vsub.f32 %v182_v17, %v185_v25 }
 0x2bc   :  { %v187_v27 = vmul.f32 1.442695, %v186_v26 }
 0x2bd   :  { %v338_v28 = vpop.permute.xlu1 %337  ;;  %v327_v29 = vpop.xlane.xlu0 %326 }
 0x2be   :  { %2056 = vpow2.f32 %v187_v27  ;;  %v328_v30 = vsub.f32 %v324_v22, %v327_v29  ;;  %v343_v46 = vsel %vm201_vm3, %v338_v28, 0 }
 0x2c0   :  { %v329_v31 = vmul.f32 1.442695, %v328_v30 }
 0x2c1   :  { %v388_v32 = vpop.permute.xlu1 %387 }
 0x2c2   :  { %2058 = vpow2.f32 %v329_v31  ;;  %1908 = vmatpush3.xpose.msk.msra.mxu0 %vm106_vm2, %v388_v32 }
 0x2c3   :  { %1912 = vmatprep.subr.bf16.mxu0 %v2124_v1 }
 0x2c8   :  { %v2057_v33 = vpop.eup %2056 }
 0x2c9   :  { %v189_v34 = vsel %vm106_vm2, %v2057_v33, 0.0 }
 0x2ca   :  { %190 = vadd.xlane.f32.xlu0 %v189_v34 }
 0x2cc   :  { %v2059_v35 = vpop.eup %2058 }
 0x2cd   :  { %v331_v36 = vsel %vm106_vm2, %v2059_v35, 0.0 }
 0x2ce   :  { %332 = vadd.xlane.f32.xlu1 %v331_v36 }
 0x2df   :  { %385 = vrot.lane.b32.xlu1 %v2225_v6, %s2131_s26 }
 0x2e0   :  { %196 = vrot.lane.b32.xlu0 %v2257_v24, %s2132_s27 }
 0x2e4   :  { %527 = vrot.lane.b32.xlu0 %v2225_v6, %s2133_s28 }
 0x2e8   :  { %525 = vrot.lane.b32.xlu0 %v2225_v6, %s2134_s29 }
 0x357   :  { %v191_v37 = vpop.xlane.xlu0 %190 }
 0x358   :  { %2060 = vrcp.f32 %v191_v37 }
 0x35b   :  { %v333_v38 = vpop.xlane.xlu1 %332  ;;  %v197_v39 = vpop.permute.xlu0 %196 }
 0x35c   :  { %2062 = vrcp.f32 %v333_v38  ;;  %v203_v40 = vsel %vm201_vm3, %v197_v39, 0  ;;  %v2355_v39 = vld [vmem:[%s2555_s1 + $0x8] sm:$0xff]  ;;  %s2137_s1 = smov 8  }
 0x35d   :  { %1891 = vmatpush3.bf16.msra.mxu1 %v203_v40 }
 0x35e   :  { %1901 = vmatprep.subr.bf16.mxu1 %v2124_v1 }
 0x35f   :  { %v386_v41 = vpop.permute.xlu1 %385  ;;  %v528_v49 = vpop.permute.xlu0 %527 }
 0x360   :  { %1910 = vmatmul.mubr.msk.f32.vlgmr.msra.gmra.mrb[6].mxu0 %vm106_vm2, %v386_v41 }
 0x361   :  { %1914 = vmatprep.mubr.msk.bf16.mxu0 %vm2125_vm0, %v2124_v1 }
 0x362   :  { %v2061_v42 = vpop.eup %2060 }
 0x363   :  { %v2280_v43 = vmul.f32 %v2061_v42, %v2057_v33  ;;  %v526_v50 = vpop.permute.xlu0 %525 }
 0x365   :  { %v194_v44 = vpack.c.bf16 %v2280_v43, %v2280_v43 }
 0x366   :  { %v2063_v45 = vpop.eup %2062 }
 0x367   :  { %1893 = vmatmul.mubr.msk.bf16.vlgmr.msra.gmra.mrb[4].mxu1 %vm106_vm2, %v194_v44  ;;  %v2288_v47 = vmul.f32 %v2063_v45, %v2059_v35 }
 0x368   :  { %1902 = vmatpush3.bf16.msra.mxu1 %v343_v46  ;;  %1903 = vmatprep.mubr.msk.bf16.mxu1 %vm2125_vm0, %v2124_v1 }
 0x369   :  { %1918 = vmatprep.subr.mxu1 %v2124_v1  ;;  %v336_v48 = vpack.c.bf16 %v2288_v47, %v2288_v47 }
 0x36f   :  { %1904 = vmatmul.mubr.msk.bf16.vlgmr.msra.gmra.mrb[8].mxu1 %vm106_vm2, %v336_v48 }
 0x370   :  { %1920 = vmatprep.mubr.msk.f32.mxu1 %vm2125_vm0, %v2124_v1 }
 0x371   :  { %1919 = vmatpush3.xpose.msk.msra.mxu1 %vm106_vm2, %v528_v49 }
 0x372   :  { %1923 = vmatprep.subr.bf16.mxu1 %v2124_v1 }
 0x377   :  { %1921 = vmatmul.mubr.msk.f32.vlgmr.msra.gmra.mrb[2].mxu1 %vm106_vm2, %v526_v50 }
 0x378   :  { %1925 = vmatprep.mubr.msk.bf16.mxu1 %vm2125_vm0, %v2124_v1 }
 0x433   :  { %v459_v51 = vpop.f32.mrb[6].mxu0 }
 0x434   :  { %v463_v52 = vmul.f32 0.35355338, %v459_v51  ;;  %v1911_v53 = vpop.f32.mrb[7].mxu0 }
 0x436   :  { %v464_v54 = vadd.f32 %v463_v52, %v2249_v14 }
 0x438   :  { %v465_v55 = vsel %vm106_vm2, %v464_v54, -inf }
 0x439   :  { %466 = vmax.xlane.f32.xlu1 %v465_v55  ;;  %v2365_v55 = vpack.c.bf16 %v2231_v8, %v2231_v8 }
 0x43a   :  { %v2303_v56 = vpop.f32.mrb[4].mxu1 }
 0x43b   :  { %v1894_v57 = vpop.f32.mrb[5].mxu1 }
 0x43c   :  { %v242_v58 = vpop.f32.mrb[6].mxu1 }
 0x43d   :  { %v1895_v59 = vpop.f32.mrb[7].mxu1 }
 0x442   :  { %v2305_v60 = vpop.f32.mrb[8].mxu1 }
 0x443   :  { %v1905_v61 = vpop.f32.mrb[9].mxu1 }
 0x444   :  { %v382_v62 = vpop.f32.mrb[10].mxu1 }
 0x445   :  { %v1906_v63 = vpop.f32.mrb[11].mxu1 }
 0x44a   :  { %v599_v0 = vpop.f32.mrb[2].mxu1  ;;  %617 = vrot.lane.b32.xlu1 %v2257_v24, %s2135_s30 }
 0x44b   :  { %v603_v2 = vmul.f32 0.35355338, %v599_v0  ;;  %v1922_v5 = vpop.f32.mrb[3].mxu1 }
 0x44d   :  { %v604_v6 = vadd.f32 %v603_v2, %v2249_v14 }
 0x44f   :  { %v605_v7 = vsel %vm106_vm2, %v604_v6, -inf }
 0x450   :  { %606 = vmax.xlane.f32.xlu0 %v605_v7 }
 0x4c6   :  { %v467_v9 = vpop.xlane.xlu1 %466 }
 0x4c7   :  { %v468_v10 = vsub.f32 %v464_v54, %v467_v9 }
 0x4c9   :  { %v469_v11 = vmul.f32 1.442695, %v468_v10 }
 0x4ca   :  { %v618_v12 = vpop.permute.xlu1 %617 }
 0x4cb   :  { %2064 = vpow2.f32 %v469_v11  ;;  %v623_v13 = vsel %vm201_vm3, %v618_v12, 0 }
 0x4cc   :  { %1924 = vmatpush3.bf16.msra.mxu1 %v623_v13 }
 0x4cd   :  { %1940 = vmatprep.subr.mxu1 %v2124_v1 }
 0x4d5   :  { %v2065_v15 = vpop.eup %2064 }
 0x4d6   :  { %v471_v16 = vsel %vm106_vm2, %v2065_v15, 0.0 }
 0x4d7   :  { %472 = vadd.xlane.f32.xlu0 %v471_v16 }
 0x4dd   :  { %v607_v17 = vpop.xlane.xlu0 %606 }
 0x4de   :  { %v608_v18 = vsub.f32 %v604_v6, %v607_v17 }
 0x4e0   :  { %v609_v14 = vmul.f32 1.442695, %v608_v18 }
 0x4e2   :  { %2066 = vpow2.f32 %v609_v14 }
 0x4ec   :  { %v2067_v19 = vpop.eup %2066 }
 0x4ed   :  { %477 = vrot.lane.b32.xlu0 %v2257_v24, %s2136_s11  ;;  %v611_v20 = vsel %vm106_vm2, %v2067_v19, 0.0 }
 0x4ee   :  { %612 = vadd.xlane.f32.xlu1 %v611_v20 }
 0x4f1   :  { %840 = vrot.lane.b32.xlu0 %v2231_v8, %s2128_s21 }
 0x4ff   :  { %699 = vrot.lane.b32.xlu1 %v2231_v8, %s2127_s3 }
 0x503   :  { %838 = vrot.lane.b32.xlu1 %v2231_v8, %s2126_s0  ;;  %s2139_s0 = smov 24  }
 0x564   :  { %v473_v21 = vpop.xlane.xlu0 %472 }
 0x565   :  { %2068 = vrcp.f32 %v473_v21 }
 0x568   :  { %v478_v22 = vpop.permute.xlu0 %477 }
 0x569   :  { %v483_v23 = vsel %vm201_vm3, %v478_v22, 0 }
 0x56a   :  { %1913 = vmatpush3.bf16.msra.mxu0 %v483_v23 }
 0x56b   :  { %1929 = vmatprep.subr.mxu0 %v2124_v1 }
 0x56c   :  { %v841_v32 = vpop.permute.xlu0 %840 }
 0x56f   :  { %v2069_v24 = vpop.eup %2068 }
 0x570   :  { %v2325_v25 = vmul.f32 %v2069_v24, %v2065_v15 }
 0x572   :  { %v476_v26 = vpack.c.bf16 %v2325_v25, %v2325_v25 }
 0x574   :  { %1915 = vmatmul.mubr.msk.bf16.vlgmr.msra.gmra.mrb[8].mxu0 %vm106_vm2, %v476_v26 }
 0x575   :  { %1931 = vmatprep.mubr.msk.f32.mxu0 %vm2125_vm0, %v2124_v1 }
 0x57b   :  { %v613_v27 = vpop.xlane.xlu1 %612 }
 0x57c   :  { %2070 = vrcp.f32 %v613_v27 }
 0x57f   :  { %v700_v28 = vpop.permute.xlu1 %699 }
 0x580   :  { %1930 = vmatpush3.xpose.msk.msra.mxu0 %vm106_vm2, %v700_v28 }
 0x581   :  { %1934 = vmatprep.subr.bf16.mxu0 %v2124_v1 }
 0x583   :  { %1932 = vmatmul.mubr.msk.f32.vlgmr.msra.gmra.mrb[12].mxu0 %vm106_vm2, %v2231_v8  ;;  %v839_v33 = vpop.permute.xlu1 %838 }
 0x584   :  { %1936 = vmatprep.mubr.msk.bf16.mxu0 %vm2125_vm0, %v2124_v1 }
 0x586   :  { %v2071_v29 = vpop.eup %2070 }
 0x587   :  { %v2338_v30 = vmul.f32 %v2071_v29, %v2067_v19 }
 0x589   :  { %v616_v31 = vpack.c.bf16 %v2338_v30, %v2338_v30 }
 0x58b   :  { %1926 = vmatmul.mubr.msk.bf16.vlgmr.msra.gmra.mrb[12].mxu1 %vm106_vm2, %v616_v31 }
 0x58c   :  { %1941 = vmatpush3.xpose.msk.msra.mxu1 %vm106_vm2, %v841_v32  ;;  %1942 = vmatprep.mubr.msk.f32.mxu1 %vm2125_vm0, %v2124_v1 }
 0x58d   :  { %1945 = vmatprep.subr.bf16.mxu1 %v2124_v1 }
 0x593   :  { %1943 = vmatmul.mubr.msk.f32.vlgmr.msra.gmra.mrb[16].mxu1 %vm106_vm2, %v839_v33 }
 0x594   :  { %1947 = vmatprep.mubr.msk.bf16.mxu1 %vm2125_vm0, %v2124_v1 }
 0x647   :  { %v2350_v34 = vpop.f32.mrb[8].mxu0 }
 0x648   :  { %v1916_v35 = vpop.f32.mrb[9].mxu0 }
 0x649   :  { %v522_v36 = vpop.f32.mrb[10].mxu0 }
 0x64a   :  { %v1917_v37 = vpop.f32.mrb[11].mxu0 }
 0x656   :  { %v771_v38 = vpop.f32.mrb[12].mxu0 }
 0x657   :  { %v775_v40 = vmul.f32 0.35355338, %v771_v38  ;;  %v1933_v41 = vpop.f32.mrb[13].mxu0 }
 0x659   :  { %v776_v42 = vadd.f32 %v775_v40, %v2355_v39 }
 0x65b   :  { %v777_v44 = vsel %vm106_vm2, %v776_v42, -inf }
 0x65c   :  { %778 = vmax.xlane.f32.xlu0 %v777_v44 }
 0x65e   :  { %v2359_v45 = vpop.f32.mrb[12].mxu1 }
 0x65f   :  { %v1927_v46 = vpop.f32.mrb[13].mxu1 }
 0x660   :  { %v662_v48 = vpop.f32.mrb[14].mxu1 }
 0x661   :  { %v1928_v49 = vpop.f32.mrb[15].mxu1 }
 0x666   :  { %v912_v50 = vpop.f32.mrb[16].mxu1 }
 0x667   :  { %v916_v51 = vmul.f32 0.35355338, %v912_v50  ;;  %v1944_v52 = vpop.f32.mrb[17].mxu1 }
 0x669   :  { %v917_v53 = vadd.f32 %v916_v51, %v2355_v39 }
 0x66b   :  { %v918_v54 = vsel %vm106_vm2, %v917_v53, -inf }
 0x66c   :  { %919 = vmax.xlane.f32.xlu1 %v918_v54 }
 0x67d   :  { %790 = vrot.lane.b32.xlu1 %v2365_v55, %s2132_s27 }
 0x681   :  { %980 = vrot.lane.b32.xlu1 %v2231_v8, %s2130_s25 }
 0x685   :  { %1120 = vrot.lane.b32.xlu1 %v2231_v8, %s2133_s28 }
 0x689   :  { %1118 = vrot.lane.b32.xlu1 %v2231_v8, %s2134_s29 }
 0x6e9   :  { %v779_v57 = vpop.xlane.xlu0 %778 }
 0x6ea   :  { %v780_v58 = vsub.f32 %v776_v42, %v779_v57 }
 0x6ec   :  { %v781_v59 = vmul.f32 1.442695, %v780_v58 }
 0x6ee   :  { %2072 = vpow2.f32 %v781_v59 }
 0x6f8   :  { %v2073_v61 = vpop.eup %2072 }
 0x6f9   :  { %v920_v62 = vpop.xlane.xlu1 %919  ;;  %v783_v63 = vsel %vm106_vm2, %v2073_v61, 0.0 }
 0x6fa   :  { %v921_v0 = vsub.f32 %v917_v53, %v920_v62  ;;  %784 = vadd.xlane.f32.xlu0 %v783_v63 }
 0x6fc   :  { %v922_v2 = vmul.f32 1.442695, %v921_v0 }
 0x6fd   :  { %v791_v5 = vpop.permute.xlu1 %790 }
 0x6fe   :  { %2074 = vpow2.f32 %v922_v2  ;;  %v796_v6 = vsel %vm201_vm3, %v791_v5, 0 }
 0x6ff   :  { %1935 = vmatpush3.bf16.msra.mxu0 %v796_v6 }
 0x700   :  { %1951 = vmatprep.subr.mxu0 %v2124_v1 }
 0x701   :  { %v981_v15 = vpop.permute.xlu1 %980 }
 0x705   :  { %v1121_v21 = vpop.permute.xlu1 %1120 }
 0x708   :  { %v2075_v7 = vpop.eup %2074 }
 0x709   :  { %v924_v9 = vsel %vm106_vm2, %v2075_v7, 0.0  ;;  %v1119_v22 = vpop.permute.xlu1 %1118 }
 0x70a   :  { %925 = vadd.xlane.f32.xlu0 %v924_v9 }
 0x720   :  { %930 = vrot.lane.b32.xlu0 %v2365_v55, %s2129_s24 }
 0x724   :  { %978 = vrot.lane.b32.xlu0 %v2231_v8, %s2131_s26 }
 0x787   :  { %v785_v10 = vpop.xlane.xlu0 %784 }
 0x788   :  { %2076 = vrcp.f32 %v785_v10 }
 0x792   :  { %v2077_v11 = vpop.eup %2076 }
 0x793   :  { %v2383_v12 = vmul.f32 %v2077_v11, %v2073_v61  ;;  %v2052_v11 = vld [vmem:[%s2558_s4] sm:$0xff]  }
 0x795   :  { %v788_v13 = vpack.c.bf16 %v2383_v12, %v2383_v12 }
 0x797   :  { %1937 = vmatmul.mubr.msk.bf16.vlgmr.msra.gmra.mrb[16].mxu0 %vm106_vm2, %v788_v13  ;;  %v926_v16 = vpop.xlane.xlu0 %925 }
 0x798   :  { %1952 = vmatpush3.xpose.msk.msra.mxu0 %vm106_vm2, %v981_v15  ;;  %2078 = vrcp.f32 %v926_v16  ;;  %1953 = vmatprep.mubr.msk.f32.mxu0 %vm2125_vm0, %v2124_v1 }
 0x799   :  { %1956 = vmatprep.subr.bf16.mxu0 %v2124_v1 }
 0x79b   :  { %v931_v8 = vpop.permute.xlu0 %930 }
 0x79c   :  { %v936_v17 = vsel %vm201_vm3, %v931_v8, 0 }
 0x79d   :  { %1946 = vmatpush3.bf16.msra.mxu1 %v936_v17 }
 0x79e   :  { %1962 = vmatprep.subr.mxu1 %v2124_v1 }
 0x79f   :  { %v979_v18 = vpop.permute.xlu0 %978 }
 0x7a0   :  { %1954 = vmatmul.mubr.msk.f32.vlgmr.msra.gmra.mrb[14].mxu0 %vm106_vm2, %v979_v18  ;;  %v2053_v18 = vld [vmem:[%s2558_s4 + $0x8] sm:$0xff]  }
 0x7a1   :  { %1958 = vmatprep.mubr.msk.bf16.mxu0 %vm2125_vm0, %v2124_v1 }
 0x7a2   :  { %v2079_v14 = vpop.eup %2078 }
 0x7a3   :  { %v2397_v19 = vmul.f32 %v2079_v14, %v2075_v7  ;;  %v2054_v14 = vld [vmem:[%s2559_s5] sm:$0xff]  }
 0x7a5   :  { %v929_v20 = vpack.c.bf16 %v2397_v19, %v2397_v19 }
 0x7a7   :  { %1948 = vmatmul.mubr.msk.bf16.vlgmr.msra.gmra.mrb[20].mxu1 %vm106_vm2, %v929_v20 }
 0x7a8   :  { %1963 = vmatpush3.xpose.msk.msra.mxu1 %vm106_vm2, %v1121_v21  ;;  %1964 = vmatprep.mubr.msk.f32.mxu1 %vm2125_vm0, %v2124_v1 }
 0x7a9   :  { %1967 = vmatprep.subr.bf16.mxu1 %v2124_v1 }
 0x7af   :  { %1965 = vmatmul.mubr.msk.f32.vlgmr.msra.gmra.mrb[18].mxu1 %vm106_vm2, %v1119_v22 }
 0x7b0   :  { %1969 = vmatprep.mubr.msk.bf16.mxu1 %vm2125_vm0, %v2124_v1 }
 0x86a   :  { %v2409_v23 = vpop.f32.mrb[16].mxu0 }
 0x86b   :  { %v1938_v24 = vpop.f32.mrb[17].mxu0 }
 0x86c   :  { %v835_v26 = vpop.f32.mrb[18].mxu0 }
 0x86d   :  { %v1939_v27 = vpop.f32.mrb[19].mxu0 }
 0x873   :  { %v1052_v28 = vpop.f32.mrb[14].mxu0 }
 0x874   :  { %v1056_v29 = vmul.f32 0.35355338, %v1052_v28  ;;  %v1955_v31 = vpop.f32.mrb[15].mxu0 }
 0x876   :  { %v1057_v32 = vadd.f32 %v1056_v29, %v2355_v39 }
 0x878   :  { %v1058_v33 = vsel %vm106_vm2, %v1057_v32, -inf }
 0x879   :  { %1059 = vmax.xlane.f32.xlu0 %v1058_v33 }
 0x87a   :  { %v972_v35 = vpop.f32.mrb[20].mxu1 }
 0x87b   :  { %v2035_v36 = vpack.i.bf16 %v972_v35, %v2305_v60  ;;  %v1949_v37 = vpop.f32.mrb[21].mxu1 }
 0x87c   :  { %v975_v38 = vpop.f32.mrb[22].mxu1 }
 0x87d   :  { %v1950_v40 = vpop.f32.mrb[23].mxu1 }
 0x882   :  { %v1192_v41 = vpop.f32.mrb[18].mxu1 }
 0x883   :  { %v1196_v42 = vmul.f32 0.35355338, %v1192_v41  ;;  %v1966_v44 = vpop.f32.mrb[19].mxu1 }
 0x885   :  { %v1197_v46 = vadd.f32 %v1196_v42, %v2355_v39 }
 0x887   :  { %v1198_v48 = vsel %vm106_vm2, %v1197_v46, -inf }
 0x888   :  { %1199 = vmax.xlane.f32.xlu1 %v1198_v48 }
 0x899   :  { %1070 = vrot.lane.b32.xlu1 %v2365_v55, %s2136_s11 }
 0x89d   :  { %2036 = vrot.lane.b32.xlu1 %v2035_v36, %s2137_s1 }
 0x906   :  { %v1060_v49 = vpop.xlane.xlu0 %1059 }
 0x907   :  { %v1061_v50 = vsub.f32 %v1057_v32, %v1060_v49 }
 0x909   :  { %v1062_v60 = vmul.f32 1.442695, %v1061_v50 }
 0x90b   :  { %2080 = vpow2.f32 %v1062_v60 }
 0x915   :  { %v2081_v51 = vpop.eup %2080  ;;  %v1200_v52 = vpop.xlane.xlu1 %1199 }
 0x916   :  { %v1201_v53 = vsub.f32 %v1197_v46, %v1200_v52  ;;  %v1064_v54 = vsel %vm106_vm2, %v2081_v51, 0.0  ;;  %v1423_v52 = vld [vmem:[%s2561_s7] sm:$0xff] }
 0x917   :  { %1065 = vadd.xlane.f32.xlu0 %v1064_v54  ;;  %v1426_v54 = vld [vmem:[%s2561_s7 + $0x18] sm:$0xff] }
 0x918   :  { %v1202_v39 = vmul.f32 1.442695, %v1201_v53  ;;  %v1424_v53 = vld [vmem:[%s2561_s7 + $0x8] sm:$0xff] }
 0x919   :  { %v1071_v57 = vpop.permute.xlu1 %1070 }
 0x91a   :  { %2082 = vpow2.f32 %v1202_v39  ;;  %v1076_v58 = vsel %vm201_vm3, %v1071_v57, 0  ;;  %v1818_v57 = vld [vmem:[%s2560_s6] ss:$0 sm:$0xff] }
 0x91b   :  { %1957 = vmatpush3.bf16.msra.mxu0 %v1076_v58 }
 0x91c   :  { %1973 = vmatprep.subr.bf16.mxu0 %v2124_v1 }
 0x91d   :  { %v2037_v26 = vpop.permute.xlu1 %2036 }
 0x91e   :  { %v2039_v28 = vunpack.i.h.bf16 %v2037_v26  ;;  %v2038_v29 = vunpack.i.l.bf16 %v2037_v26 }
 0x920   :  { %v694_v35 = vsel %vm106_vm2, %v2303_v56, %v2038_v29  ;;  %v2055_v56 = vld [vmem:[%s2559_s5 + $0x8] sm:$0xff]  }
 0x924   :  { %v2083_v59 = vpop.eup %2082 }
 0x925   :  { %v1204_v61 = vsel %vm106_vm2, %v2083_v59, 0.0 }
 0x926   :  { %1205 = vadd.xlane.f32.xlu0 %v1204_v61 }
 0x93c   :  { %1210 = vrot.lane.b32.xlu0 %v2365_v55, %s2135_s30 }
 0x9a4   :  { %v1066_v62 = vpop.xlane.xlu0 %1065 }
 0x9a5   :  { %2084 = vrcp.f32 %v1066_v62 }
 0x9af   :  { %v2085_v63 = vpop.eup %2084 }
 0x9b0   :  { %v2425_v0 = vmul.f32 %v2085_v63, %v2081_v51 }
 0x9b2   :  { %v1069_v2 = vpack.c.bf16 %v2425_v0, %v2425_v0 }
 0x9b3   :  { %v1206_v5 = vpop.xlane.xlu0 %1205 }
 0x9b4   :  { %2086 = vrcp.f32 %v1206_v5  ;;  %1959 = vmatmul.mubr.msk.bf16.vlgmr.msra.gmra.mrb[20].mxu0 %vm106_vm2, %v1069_v2 }
 0x9b5   :  { %1977 = vmatprep.mubr.msk.bf16.mxu0 %vm2125_vm0, %v2124_v1  ;;  %1974 = vmatpush3.bf16.msra.mxu0 %v2052_v11 }
 0x9b6   :  { %1975 = vmatprep.subr.bf16.mxu0 %v2124_v1 }
 0x9b7   :  { %v1211_v6 = vpop.permute.xlu0 %1210 }
 0x9b8   :  { %v1216_v7 = vsel %vm201_vm3, %v1211_v6, 0 }
 0x9b9   :  { %1968 = vmatpush3.bf16.msra.mxu1 %v1216_v7  ;;  %1976 = vmatpush3.bf16.msra.mxu0 %v2053_v18  ;;  %v39_v7 = vld [vmem:[%s2556_s2 + $0x8] sm:$0xff] }
 0x9ba   :  { %1981 = vmatprep.subr.bf16.mxu1 %v2124_v1 }
 0x9be   :  { %v2087_v55 = vpop.eup %2086 }
 0x9bf   :  { %v2434_v9 = vmul.f32 %v2087_v55, %v2083_v59  ;;  %v38_v55 = vld [vmem:[%s2556_s2] sm:$0xff] }
 0x9c1   :  { %v1209_v10 = vpack.c.bf16 %v2434_v9, %v2434_v9 }
 0x9c3   :  { %1970 = vmatmul.mubr.msk.bf16.vlgmr.msra.gmra.mrb[24].mxu1 %vm106_vm2, %v1209_v10 }
 0x9c4   :  { %1985 = vmatprep.mubr.msk.bf16.mxu1 %vm2125_vm0, %v2124_v1  ;;  %1982 = vmatpush3.bf16.msra.mxu1 %v2054_v14 }
 0x9c5   :  { %1983 = vmatprep.subr.bf16.mxu1 %v2124_v1 }
 0x9c8   :  { %1984 = vmatpush3.bf16.msra.mxu1 %v2055_v56 }
 0x9c9   :  { %2005 = vmatprep.subr.mxu1 %v2124_v1 }
 0xa87   :  { %v1112_v13 = vpop.f32.mrb[20].mxu0 }
 0xa88   :  { %v2040_v15 = vpack.i.bf16 %v1112_v13, %v2350_v34  ;;  %v1960_v16 = vpop.f32.mrb[21].mxu0 }
 0xa89   :  { %v1115_v8 = vpop.f32.mrb[22].mxu0 }
 0xa8a   :  { %2041 = vrot.lane.b32.xlu1 %v2040_v15, %s2138_s16  ;;  %v1961_v17 = vpop.f32.mrb[23].mxu0 }
 0xa96   :  { %v1252_v20 = vpop.f32.mrb[24].mxu1 }
 0xa97   :  { %v2045_v34 = vpack.i.bf16 %v1252_v20, %v2359_v45  ;;  %v1971_v21 = vpop.f32.mrb[25].mxu1  ;;  %v1285_v45 = vsel %vm106_vm2, %v2409_v23, %v2039_v28 }
 0xa98   :  { %v1255_v22 = vpop.f32.mrb[26].mxu1 }
 0xa99   :  { %2046 = vrot.lane.b32.xlu0 %v2045_v34, %s2139_s0  ;;  %v1972_v24 = vpop.f32.mrb[27].mxu1 }
 0xafc   :  { %v2042_v27 = vpop.permute.xlu1 %2041 }
 0xafd   :  { %v2044_v31 = vunpack.i.h.bf16 %v2042_v27  ;;  %v2043_v32 = vunpack.i.l.bf16 %v2042_v27 }
 0xaff   :  { %v1286_v38 = vsel %vm678_vm4, %v1285_v45, %v2044_v31  ;;  %v695_v40 = vsel %vm678_vm4, %v694_v35, %v2043_v32 }
 0xb0b   :  { %v2047_v33 = vpop.permute.xlu0 %2046 }
 0xb0c   :  { %v2049_v36 = vunpack.i.h.bf16 %v2047_v33  ;;  %v2048_v37 = vunpack.i.l.bf16 %v2047_v33 }
 0xb0e   :  { %v696_v41 = vsel %vm680_vm5, %v695_v40, %v2048_v37  ;;  %v1287_v42 = vsel %vm680_vm5, %v1286_v38, %v2049_v36 }
 0xb0f   :  { %v1290_v44 = vpack.c.bf16 %v1287_v42, %v696_v41 }
 0xb11   :  { %1978 = vmatmul.mubr.msk.bf16.vlgmr.msra.gmra.mrb[24].mxu0 %vm57_vm1, %v1290_v44 }
 0xbe4   :  { %v1344_v23 = vpop.f32.mrb[24].mxu0 }
 0xbe5   :  { %v1979_v46 = vpop.f32.mrb[25].mxu0  ;;  %v1351_v49 = vadd.f32 %v1344_v23, %v2209_v3  ;;  %v1425_v3 = vld [vmem:[%s2561_s7 + $0x10] sm:$0xff] }
 0xbe6   :  { %v1347_v48 = vpop.f32.mrb[26].mxu0  ;;  %v2014_v39 = vpack.c.bf16 %v1426_v54, %v1425_v3 }
 0xbe7   :  { %v1352_v50 = vadd.f32 %v1347_v48, %v2214_v4  ;;  %v1980_v60 = vpop.f32.mrb[27].mxu0  ;;  %v2010_v4 = vpack.c.bf16 %v1424_v53, %v1423_v52 }
 0xbe9   :  { %v1353_v51 = vpack.c.bf16 %v1352_v50, %v1351_v49  ;;  %2011 = vmatprep.subr.bf16.mxu0 %v2010_v4 }
 0xbea   :  { %2013 = vmatpush3.bf16.msra.mxu0 %v2010_v4 }
 0xbeb   :  { %1986 = vmatmul.mubr.msk.bf16.vlgmr.msra.gmra.mrb[28].mxu1 %vm57_vm1, %v1353_v51  ;;  %2015 = vmatprep.subr.bf16.mxu0 %v2014_v39 }
 0xbec   :  { %2006 = vmatpush3.msra.mxu1 %v1352_v50  ;;  %2007 = vmatprep.mubr.msk.f32.mxu1 %vm2125_vm0, %v2124_v1 }
 0xbee   :  { %2017 = vmatpush3.bf16.msra.mxu0 %v2014_v39 }
 0xbef   :  { %2000 = vmatprep.subr.mxu0 %v2124_v1 }
 0xcbe   :  { %v1414_v58 = vpop.f32.mrb[28].mxu1 }
 0xcbf   :  { %v1415_v59 = vadd.f32 %v1818_v57, %v1414_v58  ;;  %v1987_v61 = vpop.f32.mrb[29].mxu1 }
 0xcc0   :  { %v1417_v62 = vpop.f32.mrb[30].mxu1 }
 0xcc1   :  { %2088 = vtanh.f32 %v1415_v59  ;;  %v1418_v63 = vadd.f32 %v1818_v57, %v1417_v62  ;;  %v1988_v2 = vpop.f32.mrb[31].mxu1 }
 0xcc3   :  { %2090 = vtanh.f32 %v1418_v63 }
 0xccb   :  { %v2089_v5 = vpop.eup %2088 }
 0xccc   :  { %1997 = vmatprep.mubr.msk.f32.mxu0 %vm57_vm1, %v2089_v5 }
 0xccd   :  { %v2091_v6 = vpop.eup %2090 }
 0xcce   :  { %1998 = vmatmul.mubr.msk.f32.vlgmr.msra.gmra.mrb[28].mxu0 %vm57_vm1, %v2091_v6 }
 0xccf   :  { %2001 = vmatpush3.msra.mxu0 %v1351_v49  ;;  %2002 = vmatprep.mubr.msk.f32.mxu0 %vm2125_vm0, %v2124_v1 }
 0xda1   :  { %v1999_v10 = vpop.f32.mrb[28].mxu0 }
 0xda2   :  { %v1505_v11 = vadd.f32 %v1999_v10, %v39_v7  ;;  %v1499_v13 = vpop.f32.mrb[29].mxu0 }
 0xda3   :  { %v1500_v15 = vadd.f32 %v1499_v13, %v38_v55 }
 0xda4   :  { %v1633_v16 = vsel %vm1508_vm6, %v1505_v11, -inf }
 0xda5   :  { %v1634_v8 = vrot.slane %v1633_v16, 4  ;;  %v1509_v17 = vsel %vm1508_vm6, %v1500_v15, -inf }
 0xda6   :  { %v1510_v18 = vrot.slane %v1509_v17, 4 }
 0xda7   :  { %v1635_v1 = vmax.f32 %v1633_v16, %v1634_v8 }
 0xda8   :  { %v1511_v14 = vmax.f32 %v1509_v17, %v1510_v18 }
 0xda9   :  { %v1636_v20 = vrot.slane %v1635_v1, 2 }
 0xdaa   :  { %v1512_v34 = vrot.slane %v1511_v14, 2 }
 0xdab   :  { %v1637_v21 = vmax.f32 %v1635_v1, %v1636_v20 }
 0xdac   :  { %v1513_v22 = vmax.f32 %v1511_v14, %v1512_v34 }
 0xdad   :  { %v1638_v24 = vrot.slane %v1637_v21, 1 }
 0xdae   :  { %v1514_v26 = vrot.slane %v1513_v22, 1 }
 0xdaf   :  { %v1639_v27 = vmax.f32 %v1637_v21, %v1638_v24 }
 0xdb0   :  { %v1515_v28 = vmax.f32 %v1513_v22, %v1514_v26 }
 0xdb1   :  { %v1640_v29 = vsub.f32 %v1505_v11, %v1639_v27 }
 0xdb2   :  { %v1516_v31 = vsub.f32 %v1500_v15, %v1515_v28 }
 0xdb3   :  { %v1641_v32 = vmul.f32 1.442695, %v1640_v29 }
 0xdb4   :  { %v1517_v33 = vmul.f32 1.442695, %v1516_v31 }
 0xdb5   :  { %2092 = vpow2.f32 %v1641_v32 }
 0xdb6   :  { %2094 = vpow2.f32 %v1517_v33 }
 0xdbf   :  { %v2093_v35 = vpop.eup %2092 }
 0xdc0   :  { %v2095_v45 = vpop.eup %2094  ;;  %v1643_v36 = vsel %vm1508_vm6, %v2093_v35, 0.0 }
 0xdc1   :  { %v1644_v37 = vrot.slane %v1643_v36, 4  ;;  %v1519_v38 = vsel %vm1508_vm6, %v2095_v45, 0.0 }
 0xdc2   :  { %v1520_v40 = vrot.slane %v1519_v38, 4 }
 0xdc3   :  { %v1645_v41 = vadd.f32 %v1644_v37, %v1643_v36 }
 0xdc4   :  { %v1521_v42 = vadd.f32 %v1520_v40, %v1519_v38 }
 0xdc5   :  { %v1646_v44 = vrot.slane %v1645_v41, 2 }
 0xdc6   :  { %v1522_v56 = vrot.slane %v1521_v42, 2 }
 0xdc7   :  { %v1647_v23 = vadd.f32 %v1646_v44, %v1645_v41 }
 0xdc8   :  { %v1523_v46 = vadd.f32 %v1522_v56, %v1521_v42 }
 0xdc9   :  { %v1648_v48 = vrot.slane %v1647_v23, 1 }
 0xdca   :  { %v1524_v49 = vrot.slane %v1523_v46, 1 }
 0xdcb   :  { %v1649_v50 = vadd.f32 %v1648_v48, %v1647_v23 }
 0xdcc   :  { %v1525_v60 = vadd.f32 %v1524_v49, %v1523_v46 }
 0xdcd   :  { %2096 = vrcp.f32 %v1649_v50 }
 0xdce   :  { %2098 = vrcp.f32 %v1525_v60 }
 0xdd7   :  { %v2097_v51 = vpop.eup %2096 }
 0xdd8   :  { %v2099_v52 = vpop.eup %2098  ;;  %v1651_v53 = vmul.f32 %v2097_v51, %v2093_v35 }
 0xdd9   :  { %v1527_v3 = vmul.f32 %v2099_v52, %v2095_v45 }
 0xdda   :  { %1652 = vxpose.xlu1.b32.start.end [1/1] (short) (narrow) %v1651_v53, 8  ;;  %1765 = vst.msk [vmem:[%s2564_s10 + $0x8] sm:$0xff] %vm1508_vm6, %v1651_v53 }
 0xddb   :  { %1528 = vxpose.xlu0.b32.start.end [1/1] (short) (narrow) %v1527_v3, 8  ;;  %1764 = vst.msk [vmem:[%s2564_s10] sm:$0xff] %vm1508_vm6, %v1527_v3 }
 0xdf8   :  { %670 = vrot.lane.b32.xlu1 %v2325_v25, %s2138_s16 }
 0xdfc   :  { %674 = vrot.lane.b32.xlu1 %v2338_v30, %s2139_s0 }
 0xe00   :  { %1263 = vrot.lane.b32.xlu1 %v2425_v0, %s2138_s16 }
 0xe04   :  { %666 = vrot.lane.b32.xlu0 %v2288_v47, %s2137_s1 }
 0xe08   :  { %1259 = vrot.lane.b32.xlu0 %v2397_v19, %s2137_s1 }
 0xe0c   :  { %1267 = vrot.lane.b32.xlu0 %v2434_v9, %s2139_s0 }
 0xe5a   :  { %v1668_v4 = vpop.trf.xlu1 }
 0xe5b   :  { %2008 = vmatmul.mubr.msk.f32.vlgmr.msra.gmra.mrb[32].mxu1 %vm106_vm2, %v1668_v4  ;;  %v1544_v54 = vpop.trf.xlu0 }
 0xe5c   :  { %2003 = vmatmul.mubr.msk.f32.vlgmr.msra.gmra.mrb[30].mxu0 %vm106_vm2, %v1544_v54 }
 0xe6a   :  { %v671_v25 = vpop.permute.xlu1 %670 }
 0xe6e   :  { %v675_v39 = vpop.permute.xlu1 %674 }
 0xe72   :  { %v1264_v58 = vpop.permute.xlu1 %1263 }
 0xe76   :  { %v667_v30 = vpop.permute.xlu0 %666 }
 0xe77   :  { %v677_v0 = vsel %vm106_vm2, %v2280_v43, %v667_v30 }
 0xe78   :  { %v679_v47 = vsel %vm678_vm4, %v677_v0, %v671_v25 }
 0xe79   :  { %v681_v57 = vsel %vm680_vm5, %v679_v47, %v675_v39 }
 0xe7a   :  { %1288 = vst.msk [vmem:[%s2562_s8] sm:$0xff] %vm57_vm1, %v681_v57  ;;  %v1260_v19 = vpop.permute.xlu0 %1259 }
 0xe7b   :  { %v1270_v9 = vsel %vm106_vm2, %v2383_v12, %v1260_v19 }
 0xe7c   :  { %v1271_v59 = vsel %vm678_vm4, %v1270_v9, %v1264_v58 }
 0xe7e   :  { %v1268_v61 = vpop.permute.xlu0 %1267 }
 0xe7f   :  { %v1272_v62 = vsel %vm680_vm5, %v1271_v59, %v1268_v61 }
 0xe80   :  { %1289 = vst.msk [vmem:[%s2562_s8 + $0x8] sm:$0xff] %vm57_vm1, %v1272_v62 }
 0xf2e   :  { %v1753_v43 = vpop.f32.mrb[32].mxu1 }
 0xf2f   :  { %v1758_v63 = vrot.slane %v1753_v43, 7  ;;  %v2009_v2 = vpop.f32.mrb[33].mxu1  ;;  %v1629_v5 = vpop.f32.mrb[30].mxu0 }
 0xf30   :  { %v2004_v12 = vpop.f32.mrb[31].mxu0 }
 0xf31   :  { %v1761_v6 = vsel %vm1760_vm7, %v1629_v5, %v1758_v63 }
 0xf32   :  { %1763 = vst.msk [vmem:[#allocation2] sm:$0x3] %vm1762_vm8, %v1761_v6 }
 0xf33   :  { %2111 = shalt.err (!%p2108_p4)
}
 0xf34   :  { %s2112_s0 = scalar_lea.hbm %s2563_s9, 32 }
 0xf35   :  { %p2113_p5 = scmp.ne.s32.totalorder %s2563_s9, %s2112_s0  ;;  %p2116_p6 = scmp.lt.u32.totalorder %s2112_s0, %s2563_s9 }
 0xf37   :  { %p2118_p7 = pnand %p2116_p6, %p2113_p5 }
 0xf39   :  { %2121 = shalt.err (!%p2118_p7)
}
 0xf3a   :  { %1777 = dma.vmem_to_hbm [thread:$0]  %s1775_s18, 32, %s2563_s9, [#allocation3]  }
 0xf3b   :  { %2122 = dma.done.wait [#allocation3], 32  }
 0xf3c   :  { %2123 = vsyncadd [#allocation3], 4294967264 }
 0xf3d   :  { %1787 = vsyncpa [#allocation3], 1 }

</bundles_post_ra>
